<compile_context>
chip_gen: v7x
topology: tpu7x:2x2x1
jax: 0.10.0
libtpu: 0.0.40
codegen_flags: <defaults>
</compile_context>

<pallas_src>
import functools

import numpy as np
import jax
import jax.numpy as jnp
from jax import lax
from jax.experimental import pallas as pl
from jax.experimental.pallas import tpu as pltpu


# ----------------------------------------------------------------------------
# One-time parameter / constant preparation (hoisted out of the per-call path)
# ----------------------------------------------------------------------------
def _tap_masks(H, W):
    """(9, H*W) 0/1 masks: mask[t, y*W+x] = 1 iff the 3x3 tap t=(dy,dx) source
    pixel (y+dy, x+dx) lies inside the image ('same' conv, padding=1)."""
    P = H * W
    m = np.zeros((9, P), np.float32)
    t = 0
    for dy in (-1, 0, 1):
        for dx in (-1, 0, 1):
            for y in range(H):
                for x in range(W):
                    if 0 <= y + dy < H and 0 <= x + dx < W:
                        m[t, y * W + x] = 1.0
            t += 1
    return m


def prepare_params(params, H, W, tile_b):
    """Reorganize torch-layout weights into kernel-ready layouts (done once)."""
    (w1, b1, w2, b2, w3, b3, wa, ba, wv1, bv1, wv2, bv2) = params
    C1, C0 = w1.shape[0], w1.shape[1]          # 16, StateNum
    C2 = w2.shape[0]                           # 64
    A = wa.shape[0]                            # actionNum
    V = wv1.shape[0]                           # 64 (value hidden)
    P = H * W
    C0p = ((C0 + 7) // 8) * 8                  # pad conv1 input chans to 8 (sublane tile)
    OUTW = max(128, ((A + V + 127) // 128) * 128)

    # conv weights as (Cout, 9*Cin), K ordered (tap, cin); conv1 cin zero-padded.
    w1t = jnp.pad(jnp.transpose(w1, (0, 2, 3, 1)),
                  ((0, 0), (0, 0), (0, 0), (0, C0p - C0)))
    w1m = w1t.reshape(C1, 9 * C0p)                          # (16, 72)
    w2m = jnp.transpose(w2, (0, 2, 3, 1)).reshape(C2, 9 * C1)   # (64, 144)
    w3m = w3[:, :, 0, 0]                                    # (C0, C2)  1x1 conv

    # fused, lane-padded FC-head weight: cols [0,A)=policy, [A,A+V)=value hidden
    wh = jnp.zeros((C0 * P, OUTW), jnp.float32)
    wh = wh.at[:, :A].set(wa.T).at[:, A:A + V].set(wv1.T)   # (256, 128)
    bh = jnp.zeros((1, OUTW), jnp.float32)
    bh = bh.at[0, :A].set(ba).at[0, A:A + V].set(bv1)
    # val_fc2 as a lane row (zeros outside the value-hidden lanes): VPU mul+sum
    wv2row = jnp.zeros((1, OUTW), jnp.float32).at[0, A:A + V].set(wv2[0])
    bv2c = bv2.reshape(1, 1)

    masks = jnp.asarray(np.tile(_tap_masks(H, W), (1, tile_b)))  # (9, tile_b*P)

    return (masks, w1m, b1[:, None], w2m, b2[:, None], w3m, b3[:, None],
            wh, bh, wv2row, bv2c)


# ----------------------------------------------------------------------------
# Fused kernel: one grid step == TILE_B batch elements
# ----------------------------------------------------------------------------
def _shift_lanes(v, off, L):
    """out[:, l] = v[:, (l + off) mod L]  (wrap positions get masked to 0)."""
    k = off % L
    if k == 0:
        return v
    return jnp.concatenate([v[:, k:], v[:, :k]], axis=1)


def _net_kernel(x_ref, m_ref, w1_ref, b1_ref, w2_ref, b2_ref, w3_ref, b3_ref,
                wh_ref, bh_ref, wv2_ref, bv2_ref, out_ref, stage_ref,
                *, W, P, tile_b, c0, act_n):
    L = tile_b * P
    offs = tuple(dy * W + dx for dy in (-1, 0, 1) for dx in (-1, 0, 1))
    masks = m_ref[...]                                       # (9, L)
    x = x_ref[0]                                             # (C0p, L)

    def conv3x3(src, w_ref_, b_ref_):
        # roll+mask im2col (VPU/XLU work), then ONE MXU matmul per conv.
        taps = []
        for t, off in enumerate(offs):
            if off == 0:                                     # center tap: mask is all ones
                taps.append(src)
            else:
                taps.append(masks[t:t + 1, :] * _shift_lanes(src, off, L))
        patch = jnp.concatenate(taps, axis=0)                # (9*Cin, L), in vregs
        out = jnp.dot(w_ref_[...], patch, preferred_element_type=jnp.float32)
        return jnp.maximum(out + b_ref_[...], 0.0)           # (Cout, L)

    h1 = conv3x3(x, w1_ref, b1_ref)                          # (16, L)
    h2 = conv3x3(h1, w2_ref, b2_ref)                         # (64, L)
    h3 = jnp.maximum(
        jnp.dot(w3_ref[...], h2, preferred_element_type=jnp.float32)
        + b3_ref[...], 0.0)                                  # (c0, L)

    # Relayout (c0, tile_b*P) -> (tile_b, c0*P) through a tiny VMEM scratch so
    # both FC heads become a SINGLE K = c0*P = 256 matmul in batch-major layout
    # (PyTorch NCHW flatten order: column = c*P + p).
    for b in range(tile_b):
        stage_ref[b] = h3[:, b * P:(b + 1) * P]              # (c0, P) aligned blocks
    staged = stage_ref[...]                                  # (tile_b, c0, P)
    fc_in = jnp.concatenate([staged[:, c, :] for c in range(c0)], axis=-1)

    hcat = (jnp.dot(fc_in, wh_ref[...], preferred_element_type=jnp.float32)
            + bh_ref[...])                                   # (tile_b, 128)

    lane = lax.broadcasted_iota(jnp.int32, hcat.shape, 1)
    # policy head: lane-masked, numerically-stable softmax over first A lanes
    logits = jnp.where(lane < act_n, hcat, -1e30)
    mx = jnp.max(logits, axis=-1, keepdims=True)
    e = jnp.exp(logits - mx)
    probs = e * pl.reciprocal(jnp.sum(e, axis=-1, keepdims=True), approx=False)

    # value head: relu(val_fc1) . val_fc2 as a VPU multiply + lane sum (+bias)
    val = (jnp.sum(jnp.maximum(hcat, 0.0) * wv2_ref[...], axis=-1, keepdims=True)
           + bv2_ref[...])                                   # (tile_b, 1)

    # merged lane-dense output: [probs | value @ lane A | zeros]
    out_ref[0] = jnp.where(lane < act_n, probs,
                           jnp.where(lane == act_n, val, 0.0))


# ----------------------------------------------------------------------------
# Wrapper: single batch-tiled pallas_call
# ----------------------------------------------------------------------------
def net_forward(prepared, x_nchw, *, action_num, tile_b=8):
    (masks, w1m, b1c, w2m, b2c, w3m, b3c, wh, bh, wv2row, bv2c) = prepared
    B, C0, H, W = x_nchw.shape
    P = H * W
    C0p = w1m.shape[1] // 9
    L = tile_b * P
    A = action_num
    OUTW = wh.shape[1]

    nt = pl.cdiv(B, tile_b)          # >=2 steps at realistic B -> both v7x TCs busy
    Bp = nt * tile_b

    # tiny input layout prep: NCHW -> (nt, C0p, tile_b*P), images packed on lanes
    x = x_nchw.reshape(B, C0, P).astype(jnp.float32)
    x = jnp.pad(x, ((0, Bp - B), (0, C0p - C0), (0, 0)))
    x = x.reshape(nt, tile_b, C0p, P).transpose(0, 2, 1, 3).reshape(nt, C0p, L)

    def full(a):
        return pl.BlockSpec(a.shape, lambda i, _nd=a.ndim: (0,) * _nd)

    kernel = functools.partial(_net_kernel, W=W, P=P, tile_b=tile_b, c0=C0,
                               act_n=A)

    out = pl.pallas_call(
        kernel,
        grid=(nt,),
        in_specs=[
            pl.BlockSpec((1, C0p, L), lambda i: (i, 0, 0)),
            full(masks), full(w1m), full(b1c), full(w2m), full(b2c),
            full(w3m), full(b3c), full(wh), full(bh), full(wv2row), full(bv2c),
        ],
        out_specs=pl.BlockSpec((1, tile_b, OUTW), lambda i: (i, 0, 0)),
        out_shape=jax.ShapeDtypeStruct((nt, tile_b, OUTW), jnp.float32),
        scratch_shapes=[pltpu.VMEM((tile_b, C0, P), jnp.float32)],
        compiler_params=pltpu.CompilerParams(
            dimension_semantics=("parallel",)),
    )(x, masks, w1m, b1c, w2m, b2c, w3m, b3c, wh, bh, wv2row, bv2c)

    out = out.reshape(Bp, OUTW)[:B]                  # free row-major collapse
    return out[:, :A], out[:, A:A + 1]


# ----------------------------------------------------------------------------
# Deterministic parameter init (PyTorch-default-like uniform(+-1/sqrt(fan_in)))
# ----------------------------------------------------------------------------
def init_params(key, state_num, pos_num, action_num):
    ks = jax.random.split(key, 12)

    def u(k, shape, fan_in):
        bound = 1.0 / float(fan_in) ** 0.5
        return jax.random.uniform(k, shape, jnp.float32, -bound, bound)

    flat = state_num * pos_num
    w1 = u(ks[0], (16, state_num, 3, 3), state_num * 9)
    b1 = u(ks[1], (16,), state_num * 9)
    w2 = u(ks[2], (64, 16, 3, 3), 16 * 9)
    b2 = u(ks[3], (64,), 16 * 9)
    w3 = u(ks[4], (state_num, 64, 1, 1), 64)
    b3 = u(ks[5], (state_num,), 64)
    wa = u(ks[6], (action_num, flat), flat)
    ba = u(ks[7], (action_num,), flat)
    wv1 = u(ks[8], (64, flat), flat)
    bv1 = u(ks[9], (64,), flat)
    wv2 = u(ks[10], (1, 64), 64)
    bv2 = u(ks[11], (1,), 64)
    return (w1, b1, w2, b2, w3, b3, wa, ba, wv1, bv1, wv2, bv2)


# ----------------------------------------------------------------------------
# Pure-JAX reference (NCHW, PyTorch conventions) for correctness check
# ----------------------------------------------------------------------------
def reference_forward(params, x):
    (w1, b1, w2, b2, w3, b3, wa, ba, wv1, bv1, wv2, bv2) = params
    dn = ('NCHW', 'OIHW', 'NCHW')
    h = jax.nn.relu(lax.conv_general_dilated(
        x, w1, (1, 1), ((1, 1), (1, 1)), dimension_numbers=dn)
        + b1[None, :, None, None])
    h = jax.nn.relu(lax.conv_general_dilated(
        h, w2, (1, 1), ((1, 1), (1, 1)), dimension_numbers=dn)
        + b2[None, :, None, None])
    h = jax.nn.relu(lax.conv_general_dilated(
        h, w3, (1, 1), ((0, 0), (0, 0)), dimension_numbers=dn)
        + b3[None, :, None, None])
    flat = h.reshape(h.shape[0], -1)
    act = jax.nn.softmax(flat @ wa.T + ba, axis=-1)
    v = jax.nn.relu(flat @ wv1.T + bv1)
    val = v @ wv2.T + bv2
    return act, val


if __name__ == "__main__":
    # Net(xDim=8, yDim=8, stateNume=4, posNum=64, actionNum=16), batch=16
    # (TILE_B=8 -> 2 grid steps, so both TensorCores get work on v7x).
    B, C0, H, W = 16, 4, 8, 8
    pos_num = H * W
    action_num = 16
    tile_b = 8

    key = jax.random.PRNGKey(0)
    kx, kp = jax.random.split(key)
    x = jax.random.normal(kx, (B, C0, H, W), jnp.float32)
    params = init_params(kp, C0, pos_num, action_num)

    prepared = prepare_params(params, H, W, tile_b)   # one-time layout prep
    fwd = jax.jit(functools.partial(net_forward, action_num=action_num,
                                    tile_b=tile_b))

    act, val = fwd(prepared, x)
    jax.block_until_ready((act, val))

    act_r, val_r = reference_forward(params, x)
    assert act.shape == (B, action_num) and val.shape == (B, 1)
    assert jnp.allclose(act, act_r, atol=1e-4, rtol=1e-3), "policy head mismatch"
    assert jnp.allclose(val, val_r, atol=1e-4, rtol=1e-3), "value head mismatch"
    assert jnp.allclose(jnp.sum(act, axis=-1), 1.0, atol=1e-5)

    print("KERNEL_OK")
</pallas_src>

<mosaic_0001>
module attributes {stable_mosaic.version = 11 : i64} {
  func.func @_net_kernel(%arg0: i32, %arg1: memref<1x8x512xf32, #tpu.memory_space<vmem>>, %arg2: memref<9x512xf32, #tpu.memory_space<vmem>>, %arg3: memref<16x72xf32, #tpu.memory_space<vmem>>, %arg4: memref<16x1xf32, #tpu.memory_space<vmem>>, %arg5: memref<64x144xf32, #tpu.memory_space<vmem>>, %arg6: memref<64x1xf32, #tpu.memory_space<vmem>>, %arg7: memref<4x64xf32, #tpu.memory_space<vmem>>, %arg8: memref<4x1xf32, #tpu.memory_space<vmem>>, %arg9: memref<256x128xf32, #tpu.memory_space<vmem>>, %arg10: memref<1x128xf32, #tpu.memory_space<vmem>>, %arg11: memref<1x128xf32, #tpu.memory_space<vmem>>, %arg12: memref<1x1xf32, #tpu.memory_space<vmem>>, %arg13: memref<1x8x128xf32, #tpu.memory_space<vmem>>, %arg14: memref<8x4x64xf32, #tpu.memory_space<vmem>>) attributes {dimension_semantics = [#tpu.dimension_semantics<parallel>], iteration_bounds = array<i64: 2>, scalar_prefetch = 0 : i64, scratch_operands = 1 : i64, tpu.core_type = #tpu.core_type<tc>, window_params = [{transform_indices = @transform_0, window_bounds = array<i64: 1, 8, 512>}, {pipeline_mode = #tpu.pipeline_mode<synchronous>, transform_indices = @transform_1, window_bounds = array<i64: 9, 512>}, {pipeline_mode = #tpu.pipeline_mode<synchronous>, transform_indices = @transform_2, window_bounds = array<i64: 16, 72>}, {pipeline_mode = #tpu.pipeline_mode<synchronous>, transform_indices = @transform_3, window_bounds = array<i64: 16, 1>}, {pipeline_mode = #tpu.pipeline_mode<synchronous>, transform_indices = @transform_4, window_bounds = array<i64: 64, 144>}, {pipeline_mode = #tpu.pipeline_mode<synchronous>, transform_indices = @transform_5, window_bounds = array<i64: 64, 1>}, {pipeline_mode = #tpu.pipeline_mode<synchronous>, transform_indices = @transform_6, window_bounds = array<i64: 4, 64>}, {pipeline_mode = #tpu.pipeline_mode<synchronous>, transform_indices = @transform_7, window_bounds = array<i64: 4, 1>}, {pipeline_mode = #tpu.pipeline_mode<synchronous>, transform_indices = @transform_8, window_bounds = array<i64: 256, 128>}, {pipeline_mode = #tpu.pipeline_mode<synchronous>, transform_indices = @transform_9, window_bounds = array<i64: 1, 128>}, {pipeline_mode = #tpu.pipeline_mode<synchronous>, transform_indices = @transform_10, window_bounds = array<i64: 1, 128>}, {pipeline_mode = #tpu.pipeline_mode<synchronous>, transform_indices = @transform_11, window_bounds = array<i64: 1, 1>}, {transform_indices = @transform_12, window_bounds = array<i64: 1, 8, 128>}]} {
    %c0 = arith.constant 0 : index
    %c0_0 = arith.constant 0 : index
    %0 = vector.load %arg2[%c0, %c0_0] : memref<9x512xf32, #tpu.memory_space<vmem>>, vector<9x512xf32>
    %c0_1 = arith.constant 0 : index
    %c0_2 = arith.constant 0 : index
    %c0_3 = arith.constant 0 : index
    %1 = vector.load %arg1[%c0_1, %c0_2, %c0_3] : memref<1x8x512xf32, #tpu.memory_space<vmem>>, vector<1x8x512xf32>
    %2 = vector.shape_cast %1 : vector<1x8x512xf32> to vector<8x512xf32>
    %3 = vector.extract_strided_slice %0 {offsets = [0, 0], sizes = [1, 512], strides = [1, 1]} : vector<9x512xf32> to vector<1x512xf32>
    %4 = vector.extract_strided_slice %2 {offsets = [0, 503], sizes = [8, 9], strides = [1, 1]} : vector<8x512xf32> to vector<8x9xf32>
    %5 = vector.extract_strided_slice %2 {offsets = [0, 0], sizes = [8, 503], strides = [1, 1]} : vector<8x512xf32> to vector<8x503xf32>
    %6 = tpu.concatenate %4, %5 in 1 : vector<8x9xf32>, vector<8x503xf32> -> vector<8x512xf32>
    %7 = vector.broadcast %3 : vector<1x512xf32> to vector<8x512xf32>
    %8 = arith.mulf %7, %6 : vector<8x512xf32>
    %9 = vector.extract_strided_slice %0 {offsets = [1, 0], sizes = [1, 512], strides = [1, 1]} : vector<9x512xf32> to vector<1x512xf32>
    %10 = vector.extract_strided_slice %2 {offsets = [0, 504], sizes = [8, 8], strides = [1, 1]} : vector<8x512xf32> to vector<8x8xf32>
    %11 = vector.extract_strided_slice %2 {offsets = [0, 0], sizes = [8, 504], strides = [1, 1]} : vector<8x512xf32> to vector<8x504xf32>
    %12 = tpu.concatenate %10, %11 in 1 : vector<8x8xf32>, vector<8x504xf32> -> vector<8x512xf32>
    %13 = vector.broadcast %9 : vector<1x512xf32> to vector<8x512xf32>
    %14 = arith.mulf %13, %12 : vector<8x512xf32>
    %15 = vector.extract_strided_slice %0 {offsets = [2, 0], sizes = [1, 512], strides = [1, 1]} : vector<9x512xf32> to vector<1x512xf32>
    %16 = vector.extract_strided_slice %2 {offsets = [0, 505], sizes = [8, 7], strides = [1, 1]} : vector<8x512xf32> to vector<8x7xf32>
    %17 = vector.extract_strided_slice %2 {offsets = [0, 0], sizes = [8, 505], strides = [1, 1]} : vector<8x512xf32> to vector<8x505xf32>
    %18 = tpu.concatenate %16, %17 in 1 : vector<8x7xf32>, vector<8x505xf32> -> vector<8x512xf32>
    %19 = vector.broadcast %15 : vector<1x512xf32> to vector<8x512xf32>
    %20 = arith.mulf %19, %18 : vector<8x512xf32>
    %21 = vector.extract_strided_slice %0 {offsets = [3, 0], sizes = [1, 512], strides = [1, 1]} : vector<9x512xf32> to vector<1x512xf32>
    %22 = vector.extract_strided_slice %2 {offsets = [0, 511], sizes = [8, 1], strides = [1, 1]} : vector<8x512xf32> to vector<8x1xf32>
    %23 = vector.extract_strided_slice %2 {offsets = [0, 0], sizes = [8, 511], strides = [1, 1]} : vector<8x512xf32> to vector<8x511xf32>
    %24 = tpu.concatenate %22, %23 in 1 : vector<8x1xf32>, vector<8x511xf32> -> vector<8x512xf32>
    %25 = vector.broadcast %21 : vector<1x512xf32> to vector<8x512xf32>
    %26 = arith.mulf %25, %24 : vector<8x512xf32>
    %27 = vector.extract_strided_slice %0 {offsets = [5, 0], sizes = [1, 512], strides = [1, 1]} : vector<9x512xf32> to vector<1x512xf32>
    %28 = vector.extract_strided_slice %2 {offsets = [0, 1], sizes = [8, 511], strides = [1, 1]} : vector<8x512xf32> to vector<8x511xf32>
    %29 = vector.extract_strided_slice %2 {offsets = [0, 0], sizes = [8, 1], strides = [1, 1]} : vector<8x512xf32> to vector<8x1xf32>
    %30 = tpu.concatenate %28, %29 in 1 : vector<8x511xf32>, vector<8x1xf32> -> vector<8x512xf32>
    %31 = vector.broadcast %27 : vector<1x512xf32> to vector<8x512xf32>
    %32 = arith.mulf %31, %30 : vector<8x512xf32>
    %33 = vector.extract_strided_slice %0 {offsets = [6, 0], sizes = [1, 512], strides = [1, 1]} : vector<9x512xf32> to vector<1x512xf32>
    %34 = vector.extract_strided_slice %2 {offsets = [0, 7], sizes = [8, 505], strides = [1, 1]} : vector<8x512xf32> to vector<8x505xf32>
    %35 = vector.extract_strided_slice %2 {offsets = [0, 0], sizes = [8, 7], strides = [1, 1]} : vector<8x512xf32> to vector<8x7xf32>
    %36 = tpu.concatenate %34, %35 in 1 : vector<8x505xf32>, vector<8x7xf32> -> vector<8x512xf32>
    %37 = vector.broadcast %33 : vector<1x512xf32> to vector<8x512xf32>
    %38 = arith.mulf %37, %36 : vector<8x512xf32>
    %39 = vector.extract_strided_slice %0 {offsets = [7, 0], sizes = [1, 512], strides = [1, 1]} : vector<9x512xf32> to vector<1x512xf32>
    %40 = vector.extract_strided_slice %2 {offsets = [0, 8], sizes = [8, 504], strides = [1, 1]} : vector<8x512xf32> to vector<8x504xf32>
    %41 = vector.extract_strided_slice %2 {offsets = [0, 0], sizes = [8, 8], strides = [1, 1]} : vector<8x512xf32> to vector<8x8xf32>
    %42 = tpu.concatenate %40, %41 in 1 : vector<8x504xf32>, vector<8x8xf32> -> vector<8x512xf32>
    %43 = vector.broadcast %39 : vector<1x512xf32> to vector<8x512xf32>
    %44 = arith.mulf %43, %42 : vector<8x512xf32>
    %45 = vector.extract_strided_slice %0 {offsets = [8, 0], sizes = [1, 512], strides = [1, 1]} : vector<9x512xf32> to vector<1x512xf32>
    %46 = vector.extract_strided_slice %2 {offsets = [0, 9], sizes = [8, 503], strides = [1, 1]} : vector<8x512xf32> to vector<8x503xf32>
    %47 = vector.extract_strided_slice %2 {offsets = [0, 0], sizes = [8, 9], strides = [1, 1]} : vector<8x512xf32> to vector<8x9xf32>
    %48 = tpu.concatenate %46, %47 in 1 : vector<8x503xf32>, vector<8x9xf32> -> vector<8x512xf32>
    %49 = vector.broadcast %45 : vector<1x512xf32> to vector<8x512xf32>
    %50 = arith.mulf %49, %48 : vector<8x512xf32>
    %51 = tpu.concatenate %8, %14, %20, %26, %2, %32, %38, %44, %50 in 0 : vector<8x512xf32>, vector<8x512xf32>, vector<8x512xf32>, vector<8x512xf32>, vector<8x512xf32>, vector<8x512xf32>, vector<8x512xf32>, vector<8x512xf32>, vector<8x512xf32> -> vector<72x512xf32>
    %c0_4 = arith.constant 0 : index
    %c0_5 = arith.constant 0 : index
    %52 = vector.load %arg3[%c0_4, %c0_5] : memref<16x72xf32, #tpu.memory_space<vmem>>, vector<16x72xf32>
    %cst = arith.constant dense<0.000000e+00> : vector<16x512xf32>
    %53 = tpu.matmul %52, %51, %cst {dimension_numbers = #tpu.dot_dimension_numbers<[1], [0], [0], [1], [0, 0, 1, 1], [], []>} : vector<16x72xf32>, vector<72x512xf32>, vector<16x512xf32> -> vector<16x512xf32>
    %c0_6 = arith.constant 0 : index
    %c0_7 = arith.constant 0 : index
    %54 = vector.load %arg4[%c0_6, %c0_7] : memref<16x1xf32, #tpu.memory_space<vmem>>, vector<16x1xf32>
    %55 = vector.broadcast %54 : vector<16x1xf32> to vector<16x512xf32>
    %56 = arith.addf %53, %55 : vector<16x512xf32>
    %cst_8 = arith.constant 0.000000e+00 : f32
    %57 = vector.broadcast %cst_8 : f32 to vector<16x512xf32>
    %58 = arith.maximumf %56, %57 : vector<16x512xf32>
    %59 = vector.extract_strided_slice %0 {offsets = [0, 0], sizes = [1, 512], strides = [1, 1]} : vector<9x512xf32> to vector<1x512xf32>
    %60 = vector.extract_strided_slice %58 {offsets = [0, 503], sizes = [16, 9], strides = [1, 1]} : vector<16x512xf32> to vector<16x9xf32>
    %61 = vector.extract_strided_slice %58 {offsets = [0, 0], sizes = [16, 503], strides = [1, 1]} : vector<16x512xf32> to vector<16x503xf32>
    %62 = tpu.concatenate %60, %61 in 1 : vector<16x9xf32>, vector<16x503xf32> -> vector<16x512xf32>
    %63 = vector.broadcast %59 : vector<1x512xf32> to vector<16x512xf32>
    %64 = arith.mulf %63, %62 : vector<16x512xf32>
    %65 = vector.extract_strided_slice %0 {offsets = [1, 0], sizes = [1, 512], strides = [1, 1]} : vector<9x512xf32> to vector<1x512xf32>
    %66 = vector.extract_strided_slice %58 {offsets = [0, 504], sizes = [16, 8], strides = [1, 1]} : vector<16x512xf32> to vector<16x8xf32>
    %67 = vector.extract_strided_slice %58 {offsets = [0, 0], sizes = [16, 504], strides = [1, 1]} : vector<16x512xf32> to vector<16x504xf32>
    %68 = tpu.concatenate %66, %67 in 1 : vector<16x8xf32>, vector<16x504xf32> -> vector<16x512xf32>
    %69 = vector.broadcast %65 : vector<1x512xf32> to vector<16x512xf32>
    %70 = arith.mulf %69, %68 : vector<16x512xf32>
    %71 = vector.extract_strided_slice %0 {offsets = [2, 0], sizes = [1, 512], strides = [1, 1]} : vector<9x512xf32> to vector<1x512xf32>
    %72 = vector.extract_strided_slice %58 {offsets = [0, 505], sizes = [16, 7], strides = [1, 1]} : vector<16x512xf32> to vector<16x7xf32>
    %73 = vector.extract_strided_slice %58 {offsets = [0, 0], sizes = [16, 505], strides = [1, 1]} : vector<16x512xf32> to vector<16x505xf32>
    %74 = tpu.concatenate %72, %73 in 1 : vector<16x7xf32>, vector<16x505xf32> -> vector<16x512xf32>
    %75 = vector.broadcast %71 : vector<1x512xf32> to vector<16x512xf32>
    %76 = arith.mulf %75, %74 : vector<16x512xf32>
    %77 = vector.extract_strided_slice %0 {offsets = [3, 0], sizes = [1, 512], strides = [1, 1]} : vector<9x512xf32> to vector<1x512xf32>
    %78 = vector.extract_strided_slice %58 {offsets = [0, 511], sizes = [16, 1], strides = [1, 1]} : vector<16x512xf32> to vector<16x1xf32>
    %79 = vector.extract_strided_slice %58 {offsets = [0, 0], sizes = [16, 511], strides = [1, 1]} : vector<16x512xf32> to vector<16x511xf32>
    %80 = tpu.concatenate %78, %79 in 1 : vector<16x1xf32>, vector<16x511xf32> -> vector<16x512xf32>
    %81 = vector.broadcast %77 : vector<1x512xf32> to vector<16x512xf32>
    %82 = arith.mulf %81, %80 : vector<16x512xf32>
    %83 = vector.extract_strided_slice %0 {offsets = [5, 0], sizes = [1, 512], strides = [1, 1]} : vector<9x512xf32> to vector<1x512xf32>
    %84 = vector.extract_strided_slice %58 {offsets = [0, 1], sizes = [16, 511], strides = [1, 1]} : vector<16x512xf32> to vector<16x511xf32>
    %85 = vector.extract_strided_slice %58 {offsets = [0, 0], sizes = [16, 1], strides = [1, 1]} : vector<16x512xf32> to vector<16x1xf32>
    %86 = tpu.concatenate %84, %85 in 1 : vector<16x511xf32>, vector<16x1xf32> -> vector<16x512xf32>
    %87 = vector.broadcast %83 : vector<1x512xf32> to vector<16x512xf32>
    %88 = arith.mulf %87, %86 : vector<16x512xf32>
    %89 = vector.extract_strided_slice %0 {offsets = [6, 0], sizes = [1, 512], strides = [1, 1]} : vector<9x512xf32> to vector<1x512xf32>
    %90 = vector.extract_strided_slice %58 {offsets = [0, 7], sizes = [16, 505], strides = [1, 1]} : vector<16x512xf32> to vector<16x505xf32>
    %91 = vector.extract_strided_slice %58 {offsets = [0, 0], sizes = [16, 7], strides = [1, 1]} : vector<16x512xf32> to vector<16x7xf32>
    %92 = tpu.concatenate %90, %91 in 1 : vector<16x505xf32>, vector<16x7xf32> -> vector<16x512xf32>
    %93 = vector.broadcast %89 : vector<1x512xf32> to vector<16x512xf32>
    %94 = arith.mulf %93, %92 : vector<16x512xf32>
    %95 = vector.extract_strided_slice %0 {offsets = [7, 0], sizes = [1, 512], strides = [1, 1]} : vector<9x512xf32> to vector<1x512xf32>
    %96 = vector.extract_strided_slice %58 {offsets = [0, 8], sizes = [16, 504], strides = [1, 1]} : vector<16x512xf32> to vector<16x504xf32>
    %97 = vector.extract_strided_slice %58 {offsets = [0, 0], sizes = [16, 8], strides = [1, 1]} : vector<16x512xf32> to vector<16x8xf32>
    %98 = tpu.concatenate %96, %97 in 1 : vector<16x504xf32>, vector<16x8xf32> -> vector<16x512xf32>
    %99 = vector.broadcast %95 : vector<1x512xf32> to vector<16x512xf32>
    %100 = arith.mulf %99, %98 : vector<16x512xf32>
    %101 = vector.extract_strided_slice %0 {offsets = [8, 0], sizes = [1, 512], strides = [1, 1]} : vector<9x512xf32> to vector<1x512xf32>
    %102 = vector.extract_strided_slice %58 {offsets = [0, 9], sizes = [16, 503], strides = [1, 1]} : vector<16x512xf32> to vector<16x503xf32>
    %103 = vector.extract_strided_slice %58 {offsets = [0, 0], sizes = [16, 9], strides = [1, 1]} : vector<16x512xf32> to vector<16x9xf32>
    %104 = tpu.concatenate %102, %103 in 1 : vector<16x503xf32>, vector<16x9xf32> -> vector<16x512xf32>
    %105 = vector.broadcast %101 : vector<1x512xf32> to vector<16x512xf32>
    %106 = arith.mulf %105, %104 : vector<16x512xf32>
    %107 = tpu.concatenate %64, %70, %76, %82, %58, %88, %94, %100, %106 in 0 : vector<16x512xf32>, vector<16x512xf32>, vector<16x512xf32>, vector<16x512xf32>, vector<16x512xf32>, vector<16x512xf32>, vector<16x512xf32>, vector<16x512xf32>, vector<16x512xf32> -> vector<144x512xf32>
    %c0_9 = arith.constant 0 : index
    %c0_10 = arith.constant 0 : index
    %108 = vector.load %arg5[%c0_9, %c0_10] : memref<64x144xf32, #tpu.memory_space<vmem>>, vector<64x144xf32>
    %cst_11 = arith.constant dense<0.000000e+00> : vector<64x512xf32>
    %109 = tpu.matmul %108, %107, %cst_11 {dimension_numbers = #tpu.dot_dimension_numbers<[1], [0], [0], [1], [0, 0, 1, 1], [], []>} : vector<64x144xf32>, vector<144x512xf32>, vector<64x512xf32> -> vector<64x512xf32>
    %c0_12 = arith.constant 0 : index
    %c0_13 = arith.constant 0 : index
    %110 = vector.load %arg6[%c0_12, %c0_13] : memref<64x1xf32, #tpu.memory_space<vmem>>, vector<64x1xf32>
    %111 = vector.broadcast %110 : vector<64x1xf32> to vector<64x512xf32>
    %112 = arith.addf %109, %111 : vector<64x512xf32>
    %cst_14 = arith.constant 0.000000e+00 : f32
    %113 = vector.broadcast %cst_14 : f32 to vector<64x512xf32>
    %114 = arith.maximumf %112, %113 : vector<64x512xf32>
    %c0_15 = arith.constant 0 : index
    %c0_16 = arith.constant 0 : index
    %115 = vector.load %arg7[%c0_15, %c0_16] : memref<4x64xf32, #tpu.memory_space<vmem>>, vector<4x64xf32>
    %cst_17 = arith.constant dense<0.000000e+00> : vector<4x512xf32>
    %116 = tpu.matmul %115, %114, %cst_17 {dimension_numbers = #tpu.dot_dimension_numbers<[1], [0], [0], [1], [0, 0, 1, 1], [], []>} : vector<4x64xf32>, vector<64x512xf32>, vector<4x512xf32> -> vector<4x512xf32>
    %c0_18 = arith.constant 0 : index
    %c0_19 = arith.constant 0 : index
    %117 = vector.load %arg8[%c0_18, %c0_19] : memref<4x1xf32, #tpu.memory_space<vmem>>, vector<4x1xf32>
    %118 = vector.broadcast %117 : vector<4x1xf32> to vector<4x512xf32>
    %119 = arith.addf %116, %118 : vector<4x512xf32>
    %cst_20 = arith.constant 0.000000e+00 : f32
    %120 = vector.broadcast %cst_20 : f32 to vector<4x512xf32>
    %121 = arith.maximumf %119, %120 : vector<4x512xf32>
    %122 = vector.extract_strided_slice %121 {offsets = [0, 0], sizes = [4, 64], strides = [1, 1]} : vector<4x512xf32> to vector<4x64xf32>
    %c0_21 = arith.constant 0 : index
    %c0_22 = arith.constant 0 : index
    %c0_23 = arith.constant 0 : index
    %123 = vector.load %arg14[%c0_21, %c0_22, %c0_23] : memref<8x4x64xf32, #tpu.memory_space<vmem>>, vector<1x4x64xf32>
    %124 = vector.shape_cast %123 : vector<1x4x64xf32> to vector<4x64xf32>
    %125 = vector.shape_cast %122 : vector<4x64xf32> to vector<1x4x64xf32>
    tpu.vector_store %arg14[%c0_21, %c0_22, %c0_23], %125 {strides = array<i32>} : memref<8x4x64xf32, #tpu.memory_space<vmem>>, vector<1x4x64xf32>,
    %126 = vector.extract_strided_slice %121 {offsets = [0, 64], sizes = [4, 64], strides = [1, 1]} : vector<4x512xf32> to vector<4x64xf32>
    %c1 = arith.constant 1 : index
    %c0_24 = arith.constant 0 : index
    %c0_25 = arith.constant 0 : index
    %127 = vector.load %arg14[%c1, %c0_24, %c0_25] : memref<8x4x64xf32, #tpu.memory_space<vmem>>, vector<1x4x64xf32>
    %128 = vector.shape_cast %127 : vector<1x4x64xf32> to vector<4x64xf32>
    %129 = vector.shape_cast %126 : vector<4x64xf32> to vector<1x4x64xf32>
    tpu.vector_store %arg14[%c1, %c0_24, %c0_25], %129 {strides = array<i32>} : memref<8x4x64xf32, #tpu.memory_space<vmem>>, vector<1x4x64xf32>,
    %130 = vector.extract_strided_slice %121 {offsets = [0, 128], sizes = [4, 64], strides = [1, 1]} : vector<4x512xf32> to vector<4x64xf32>
    %c2 = arith.constant 2 : index
    %c0_26 = arith.constant 0 : index
    %c0_27 = arith.constant 0 : index
    %131 = vector.load %arg14[%c2, %c0_26, %c0_27] : memref<8x4x64xf32, #tpu.memory_space<vmem>>, vector<1x4x64xf32>
    %132 = vector.shape_cast %131 : vector<1x4x64xf32> to vector<4x64xf32>
    %133 = vector.shape_cast %130 : vector<4x64xf32> to vector<1x4x64xf32>
    tpu.vector_store %arg14[%c2, %c0_26, %c0_27], %133 {strides = array<i32>} : memref<8x4x64xf32, #tpu.memory_space<vmem>>, vector<1x4x64xf32>,
    %134 = vector.extract_strided_slice %121 {offsets = [0, 192], sizes = [4, 64], strides = [1, 1]} : vector<4x512xf32> to vector<4x64xf32>
    %c3 = arith.constant 3 : index
    %c0_28 = arith.constant 0 : index
    %c0_29 = arith.constant 0 : index
    %135 = vector.load %arg14[%c3, %c0_28, %c0_29] : memref<8x4x64xf32, #tpu.memory_space<vmem>>, vector<1x4x64xf32>
    %136 = vector.shape_cast %135 : vector<1x4x64xf32> to vector<4x64xf32>
    %137 = vector.shape_cast %134 : vector<4x64xf32> to vector<1x4x64xf32>
    tpu.vector_store %arg14[%c3, %c0_28, %c0_29], %137 {strides = array<i32>} : memref<8x4x64xf32, #tpu.memory_space<vmem>>, vector<1x4x64xf32>,
    %138 = vector.extract_strided_slice %121 {offsets = [0, 256], sizes = [4, 64], strides = [1, 1]} : vector<4x512xf32> to vector<4x64xf32>
    %c4 = arith.constant 4 : index
    %c0_30 = arith.constant 0 : index
    %c0_31 = arith.constant 0 : index
    %139 = vector.load %arg14[%c4, %c0_30, %c0_31] : memref<8x4x64xf32, #tpu.memory_space<vmem>>, vector<1x4x64xf32>
    %140 = vector.shape_cast %139 : vector<1x4x64xf32> to vector<4x64xf32>
    %141 = vector.shape_cast %138 : vector<4x64xf32> to vector<1x4x64xf32>
    tpu.vector_store %arg14[%c4, %c0_30, %c0_31], %141 {strides = array<i32>} : memref<8x4x64xf32, #tpu.memory_space<vmem>>, vector<1x4x64xf32>,
    %142 = vector.extract_strided_slice %121 {offsets = [0, 320], sizes = [4, 64], strides = [1, 1]} : vector<4x512xf32> to vector<4x64xf32>
    %c5 = arith.constant 5 : index
    %c0_32 = arith.constant 0 : index
    %c0_33 = arith.constant 0 : index
    %143 = vector.load %arg14[%c5, %c0_32, %c0_33] : memref<8x4x64xf32, #tpu.memory_space<vmem>>, vector<1x4x64xf32>
    %144 = vector.shape_cast %143 : vector<1x4x64xf32> to vector<4x64xf32>
    %145 = vector.shape_cast %142 : vector<4x64xf32> to vector<1x4x64xf32>
    tpu.vector_store %arg14[%c5, %c0_32, %c0_33], %145 {strides = array<i32>} : memref<8x4x64xf32, #tpu.memory_space<vmem>>, vector<1x4x64xf32>,
    %146 = vector.extract_strided_slice %121 {offsets = [0, 384], sizes = [4, 64], strides = [1, 1]} : vector<4x512xf32> to vector<4x64xf32>
    %c6 = arith.constant 6 : index
    %c0_34 = arith.constant 0 : index
    %c0_35 = arith.constant 0 : index
    %147 = vector.load %arg14[%c6, %c0_34, %c0_35] : memref<8x4x64xf32, #tpu.memory_space<vmem>>, vector<1x4x64xf32>
    %148 = vector.shape_cast %147 : vector<1x4x64xf32> to vector<4x64xf32>
    %149 = vector.shape_cast %146 : vector<4x64xf32> to vector<1x4x64xf32>
    tpu.vector_store %arg14[%c6, %c0_34, %c0_35], %149 {strides = array<i32>} : memref<8x4x64xf32, #tpu.memory_space<vmem>>, vector<1x4x64xf32>,
    %150 = vector.extract_strided_slice %121 {offsets = [0, 448], sizes = [4, 64], strides = [1, 1]} : vector<4x512xf32> to vector<4x64xf32>
    %c7 = arith.constant 7 : index
    %c0_36 = arith.constant 0 : index
    %c0_37 = arith.constant 0 : index
    %151 = vector.load %arg14[%c7, %c0_36, %c0_37] : memref<8x4x64xf32, #tpu.memory_space<vmem>>, vector<1x4x64xf32>
    %152 = vector.shape_cast %151 : vector<1x4x64xf32> to vector<4x64xf32>
    %153 = vector.shape_cast %150 : vector<4x64xf32> to vector<1x4x64xf32>
    tpu.vector_store %arg14[%c7, %c0_36, %c0_37], %153 {strides = array<i32>} : memref<8x4x64xf32, #tpu.memory_space<vmem>>, vector<1x4x64xf32>,
    %c0_38 = arith.constant 0 : index
    %c0_39 = arith.constant 0 : index
    %c0_40 = arith.constant 0 : index
    %154 = vector.load %arg14[%c0_38, %c0_39, %c0_40] : memref<8x4x64xf32, #tpu.memory_space<vmem>>, vector<8x4x64xf32>
    %155 = vector.extract_strided_slice %154 {offsets = [0, 0, 0], sizes = [8, 1, 64], strides = [1, 1, 1]} : vector<8x4x64xf32> to vector<8x1x64xf32>
    %156 = vector.shape_cast %155 : vector<8x1x64xf32> to vector<8x64xf32>
    %157 = vector.extract_strided_slice %154 {offsets = [0, 1, 0], sizes = [8, 1, 64], strides = [1, 1, 1]} : vector<8x4x64xf32> to vector<8x1x64xf32>
    %158 = vector.shape_cast %157 : vector<8x1x64xf32> to vector<8x64xf32>
    %159 = vector.extract_strided_slice %154 {offsets = [0, 2, 0], sizes = [8, 1, 64], strides = [1, 1, 1]} : vector<8x4x64xf32> to vector<8x1x64xf32>
    %160 = vector.shape_cast %159 : vector<8x1x64xf32> to vector<8x64xf32>
    %161 = vector.extract_strided_slice %154 {offsets = [0, 3, 0], sizes = [8, 1, 64], strides = [1, 1, 1]} : vector<8x4x64xf32> to vector<8x1x64xf32>
    %162 = vector.shape_cast %161 : vector<8x1x64xf32> to vector<8x64xf32>
    %163 = tpu.concatenate %156, %158, %160, %162 in 1 : vector<8x64xf32>, vector<8x64xf32>, vector<8x64xf32>, vector<8x64xf32> -> vector<8x256xf32>
    %c0_41 = arith.constant 0 : index
    %c0_42 = arith.constant 0 : index
    %164 = vector.load %arg9[%c0_41, %c0_42] : memref<256x128xf32, #tpu.memory_space<vmem>>, vector<256x128xf32>
    %cst_43 = arith.constant dense<0.000000e+00> : vector<8x128xf32>
    %165 = tpu.matmul %163, %164, %cst_43 {dimension_numbers = #tpu.dot_dimension_numbers<[1], [0], [0], [1], [0, 0, 1, 1], [], []>} : vector<8x256xf32>, vector<256x128xf32>, vector<8x128xf32> -> vector<8x128xf32>
    %c0_44 = arith.constant 0 : index
    %c0_45 = arith.constant 0 : index
    %166 = vector.load %arg10[%c0_44, %c0_45] : memref<1x128xf32, #tpu.memory_space<vmem>>, vector<1x128xf32>
    %167 = vector.broadcast %166 : vector<1x128xf32> to vector<8x128xf32>
    %168 = arith.addf %165, %167 : vector<8x128xf32>
    %169 = tpu.iota {dimensions = array<i32: 1>} : vector<8x128xi32>
    %c16_i32 = arith.constant 16 : i32
    %170 = vector.broadcast %c16_i32 : i32 to vector<8x128xi32>
    %171 = arith.cmpi slt, %169, %170 : vector<8x128xi32>
    %cst_46 = arith.constant -1.000000e+30 : f32
    %172 = vector.broadcast %cst_46 : f32 to vector<8x128xf32>
    %173 = arith.select %171, %168, %172 : vector<8x128xi1>, vector<8x128xf32>
    %cst_47 = arith.constant dense<0xFF800000> : vector<8xf32>
    %174 = vector.multi_reduction <maximumf>, %173, %cst_47 [1] : vector<8x128xf32> to vector<8xf32>
    %175 = vector.shape_cast %174 : vector<8xf32> to vector<8x1xf32>
    %176 = vector.broadcast %175 : vector<8x1xf32> to vector<8x128xf32>
    %177 = arith.subf %173, %176 : vector<8x128xf32>
    %178 = math.exp %177 : vector<8x128xf32>
    %cst_48 = arith.constant dense<0.000000e+00> : vector<8xf32>
    %179 = vector.multi_reduction <add>, %178, %cst_48 [1] : vector<8x128xf32> to vector<8xf32>
    %180 = vector.shape_cast %179 : vector<8xf32> to vector<8x1xf32>
    %181 = tpu.reciprocal %180 : vector<8x1xf32> -> vector<8x1xf32>
    %182 = vector.broadcast %181 : vector<8x1xf32> to vector<8x128xf32>
    %183 = arith.mulf %178, %182 : vector<8x128xf32>
    %cst_49 = arith.constant 0.000000e+00 : f32
    %184 = vector.broadcast %cst_49 : f32 to vector<8x128xf32>
    %185 = arith.maximumf %168, %184 : vector<8x128xf32>
    %c0_50 = arith.constant 0 : index
    %c0_51 = arith.constant 0 : index
    %186 = vector.load %arg11[%c0_50, %c0_51] : memref<1x128xf32, #tpu.memory_space<vmem>>, vector<1x128xf32>
    %187 = vector.broadcast %186 : vector<1x128xf32> to vector<8x128xf32>
    %188 = arith.mulf %185, %187 : vector<8x128xf32>
    %cst_52 = arith.constant dense<0.000000e+00> : vector<8xf32>
    %189 = vector.multi_reduction <add>, %188, %cst_52 [1] : vector<8x128xf32> to vector<8xf32>
    %190 = vector.shape_cast %189 : vector<8xf32> to vector<8x1xf32>
    %c0_53 = arith.constant 0 : index
    %c0_54 = arith.constant 0 : index
    %191 = vector.load %arg12[%c0_53, %c0_54] : memref<1x1xf32, #tpu.memory_space<vmem>>, vector<1x1xf32>
    %192 = vector.broadcast %191 : vector<1x1xf32> to vector<8x1xf32>
    %193 = arith.addf %190, %192 : vector<8x1xf32>
    %c16_i32_55 = arith.constant 16 : i32
    %194 = vector.broadcast %c16_i32_55 : i32 to vector<8x128xi32>
    %195 = arith.cmpi slt, %169, %194 : vector<8x128xi32>
    %c16_i32_56 = arith.constant 16 : i32
    %196 = vector.broadcast %c16_i32_56 : i32 to vector<8x128xi32>
    %197 = arith.cmpi eq, %169, %196 : vector<8x128xi32>
    %cst_57 = arith.constant 0.000000e+00 : f32
    %198 = vector.shape_cast %193 : vector<8x1xf32> to vector<8x1xf32>
    %199 = vector.broadcast %198 : vector<8x1xf32> to vector<8x128xf32>
    %200 = vector.broadcast %cst_57 : f32 to vector<8x128xf32>
    %201 = arith.select %197, %199, %200 : vector<8x128xi1>, vector<8x128xf32>
    %202 = arith.select %195, %183, %201 : vector<8x128xi1>, vector<8x128xf32>
    %c0_58 = arith.constant 0 : index
    %c0_59 = arith.constant 0 : index
    %c0_60 = arith.constant 0 : index
    %203 = vector.load %arg13[%c0_58, %c0_59, %c0_60] : memref<1x8x128xf32, #tpu.memory_space<vmem>>, vector<1x8x128xf32>
    %204 = vector.shape_cast %203 : vector<1x8x128xf32> to vector<8x128xf32>
    %205 = vector.shape_cast %202 : vector<8x128xf32> to vector<1x8x128xf32>
    tpu.vector_store %arg13[%c0_58, %c0_59, %c0_60], %205 {strides = array<i32>} : memref<1x8x128xf32, #tpu.memory_space<vmem>>, vector<1x8x128xf32>,
    return
  }
  func.func @transform_0(%arg0: i32) -> (i32, i32, i32) {
    %c0_i32 = arith.constant 0 : i32
    %c0_i32_0 = arith.constant 0 : i32
    %c0_i32_1 = arith.constant 0 : i32
    return %arg0, %c0_i32, %c0_i32_0 : i32, i32, i32
  }
  func.func @transform_1(%arg0: i32) -> (i32, i32) {
    %c0_i32 = arith.constant 0 : i32
    %c0_i32_0 = arith.constant 0 : i32
    %c0_i32_1 = arith.constant 0 : i32
    return %c0_i32, %c0_i32_0 : i32, i32
  }
  func.func @transform_2(%arg0: i32) -> (i32, i32) {
    %c0_i32 = arith.constant 0 : i32
    %c0_i32_0 = arith.constant 0 : i32
    %c0_i32_1 = arith.constant 0 : i32
    return %c0_i32, %c0_i32_0 : i32, i32
  }
  func.func @transform_3(%arg0: i32) -> (i32, i32) {
    %c0_i32 = arith.constant 0 : i32
    %c0_i32_0 = arith.constant 0 : i32
    %c0_i32_1 = arith.constant 0 : i32
    return %c0_i32, %c0_i32_0 : i32, i32
  }
  func.func @transform_4(%arg0: i32) -> (i32, i32) {
    %c0_i32 = arith.constant 0 : i32
    %c0_i32_0 = arith.constant 0 : i32
    %c0_i32_1 = arith.constant 0 : i32
    return %c0_i32, %c0_i32_0 : i32, i32
  }
  func.func @transform_5(%arg0: i32) -> (i32, i32) {
    %c0_i32 = arith.constant 0 : i32
    %c0_i32_0 = arith.constant 0 : i32
    %c0_i32_1 = arith.constant 0 : i32
    return %c0_i32, %c0_i32_0 : i32, i32
  }
  func.func @transform_6(%arg0: i32) -> (i32, i32) {
    %c0_i32 = arith.constant 0 : i32
    %c0_i32_0 = arith.constant 0 : i32
    %c0_i32_1 = arith.constant 0 : i32
    return %c0_i32, %c0_i32_0 : i32, i32
  }
  func.func @transform_7(%arg0: i32) -> (i32, i32) {
    %c0_i32 = arith.constant 0 : i32
    %c0_i32_0 = arith.constant 0 : i32
    %c0_i32_1 = arith.constant 0 : i32
    return %c0_i32, %c0_i32_0 : i32, i32
  }
  func.func @transform_8(%arg0: i32) -> (i32, i32) {
    %c0_i32 = arith.constant 0 : i32
    %c0_i32_0 = arith.constant 0 : i32
    %c0_i32_1 = arith.constant 0 : i32
    return %c0_i32, %c0_i32_0 : i32, i32
  }
  func.func @transform_9(%arg0: i32) -> (i32, i32) {
    %c0_i32 = arith.constant 0 : i32
    %c0_i32_0 = arith.constant 0 : i32
    %c0_i32_1 = arith.constant 0 : i32
    return %c0_i32, %c0_i32_0 : i32, i32
  }
  func.func @transform_10(%arg0: i32) -> (i32, i32) {
    %c0_i32 = arith.constant 0 : i32
    %c0_i32_0 = arith.constant 0 : i32
    %c0_i32_1 = arith.constant 0 : i32
    return %c0_i32, %c0_i32_0 : i32, i32
  }
  func.func @transform_11(%arg0: i32) -> (i32, i32) {
    %c0_i32 = arith.constant 0 : i32
    %c0_i32_0 = arith.constant 0 : i32
    %c0_i32_1 = arith.constant 0 : i32
    return %c0_i32, %c0_i32_0 : i32, i32
  }
  func.func @transform_12(%arg0: i32) -> (i32, i32, i32) {
    %c0_i32 = arith.constant 0 : i32
    %c0_i32_0 = arith.constant 0 : i32
    %c0_i32_1 = arith.constant 0 : i32
    return %arg0, %c0_i32, %c0_i32_0 : i32, i32, i32
  }
}

</mosaic_0001>

<bundles_post_ra>
// kernel: net_forward.1
= control target key start
LH: loop header
LB: loop body
LE: loop exit
PB: predicated region body
PF: predicated region fallthrough
CT: control target
= control target key end

     0   :  { %s2449_s23 = smov 0   ;;  %s3448_s0 = inlined_call_operand.vmem [shape: f32[2,8,512], index: 0, kind: input, shape index: {}]   ;;  %s3449_s1 = inlined_call_operand.vmem [shape: f32[9,512], index: 1, kind: input, shape index: {}]   ;;  %s3450_s2 = inlined_call_operand.vmem [shape: f32[16,72], index: 2, kind: input, shape index: {}]   ;;  %s3451_s3 = inlined_call_operand.vmem [shape: f32[16,1], index: 3, kind: input, shape index: {}]   ;;  %s3452_s4 = inlined_call_operand.vmem [shape: f32[64,144], index: 4, kind: input, shape index: {}]   ;;  %s3453_s5 = inlined_call_operand.vmem [shape: f32[64,1], index: 5, kind: input, shape index: {}]   ;;  %s3454_s6 = inlined_call_operand.vmem [shape: f32[4,64], index: 6, kind: input, shape index: {}]   ;;  %s3455_s7 = inlined_call_operand.vmem [shape: f32[4,1], index: 7, kind: input, shape index: {}]   ;;  %s3456_s8 = inlined_call_operand.vmem [shape: f32[256,128], index: 8, kind: input, shape index: {}]   ;;  %s3457_s9 = inlined_call_operand.vmem [shape: f32[1,128], index: 9, kind: input, shape index: {}]   ;;  %s3458_s10 = inlined_call_operand.vmem [shape: f32[1,128], index: 10, kind: input, shape index: {}]   ;;  %s3459_s11 = inlined_call_operand.<no memory space> [shape: f32[1,1], index: 11, kind: input, shape index: {}]   ;;  %s3460_s12 = inlined_call_operand.vmem [shape: f32[2,8,128], index: 12, kind: output, shape index: {}]  }
   0x1   :  { %v17_v0 = vstv %s3459_s11 }
   0x2   :  { %18 = vst [vmem:[#allocation3] sm:$0x1] %v17_v0 }
   0x3 LB: > { %s2089_s24 = sadd.s32 4294967295, %s2368_s23   ;;  %p2093_p0 = scmp.ge.s32.totalorder %s2368_s23, 1  ;;  %s2368_s23 = sphi %s2449_s23, %s24_s23  }
   0x4   : > { %p364_p1 = scmp.lt.s32.totalorder %s2368_s23, 3 }
   0x6   : > { %p365_p2 = pnand %p2093_p0, %p364_p1 }
   0x8   : > { %368 = sbr.rel (%p365_p2) target bundleno = 1913 (0x779), region = 68 }
   0xf   : > { %p405_p3 = scmp.lt.s32.totalorder %s2089_s24, 1  ;;  %s2370_s28 = smov 8   ;;  %v3462_v5 = vmov 0.0   ;;  %v2379_v6 = vmov 0   ;;  %v736_v7 = vld [vmem:[%s3451_s3] sm:$0xff]  ;;  %v737_v8 = vld [vmem:[%s3451_s3 + $0x8] sm:$0xff]  ;;  %v3461_v9 = vlaneseq }
  0x10   : > { %s2371_s29 = smov 9   ;;  %s2372_s30 = smov 7   ;;  %819 = vmatprep.mubr.f32.mxu0 %v3462_v5  ;;  %896 = vmatprep.mubr.f32.mxu1 %v3462_v5  ;;  %v2551_v13 = vld [vmem:[%s3449_s1 + $0x8] sm:$0xff]  ;;  %vm439_vm0 = vcmask 72704   ;;  %vm477_vm1 = vcmask 64512   ;;  %v2564_v22 = vld [vmem:[%s3449_s1] sm:$0xff] }
  0x11   : > { %s3552_s24 = smov (!%p405_p3, %s2089_s24), 1  ;;  %s2373_s13 = smov 1   ;;  %2351 = vset.pattern.permute.xlu0 %v2379_v6  ;;  %2352 = vset.pattern.permute.xlu1 %v2379_v6  ;;  %v2544_v10 = vshrl.u32 %v3461_v9, 7  ;;  %v2571_v25 = vld [vmem:[%s3449_s1 + $0x18] sm:$0xff]  ;;  %v2576_v26 = vld [vmem:[%s3449_s1 + $0x10] sm:$0xff]  ;;  %vm515_vm2 = vcmask 56320  }
  0x12   : > { %s2128_s11 = sshll.u32 %s3552_s24, 5  ;;  %s2374_s14 = smov 127   ;;  %vm553_vm3 = vcmask 7168   ;;  %vm590_vm4 = vcmask 1039360   ;;  %vm628_vm5 = vcmask 990208   ;;  %vm666_vm6 = vcmask 982016  }
  0x13   : > { %s409_s27 = scalar_lea.vmem %s3448_s0, %s2128_s11  ;;  %s2375_s15 = smov 121   ;;  %v450_v11 = vsub.s32 0, %v2544_v10  ;;  %v488_v12 = vsub.s32 1, %v2544_v10  ;;  %v526_v41 = vsub.s32 2, %v2544_v10  ;;  %v564_v43 = vsub.s32 3, %v2544_v10 }
  0x14   : > { %v2463_v1 = vld [vmem:[%s409_s27] sm:$0xff]  ;;  %v2469_v2 = vld [vmem:[%s409_s27 + $0x8] sm:$0xff]  ;;  %v2475_v3 = vld [vmem:[%s409_s27 + $0x10] sm:$0xff]  ;;  %s2376_s16 = smov 120   ;;  %s2378_s17 = smov 119   ;;  %vm704_vm7 = vcmask 973824  }
  0x15   : > { %471 = vrot.lane.b32.xlu1 %v2463_v1, %s2370_s28  ;;  %433 = vrot.lane.b32.xlu0 %v2463_v1, %s2371_s29  ;;  %v2477_v4 = vld [vmem:[%s409_s27 + $0x18] sm:$0xff]  ;;  %v2554_v16 = vrot.slane %v2551_v13, %v450_v11  ;;  %v2557_v17 = vrot.slane %v2551_v13, %v488_v12  ;;  %v2579_v30 = vrot.slane %v2564_v22, %v450_v11  ;;  %vm748_vm8 = vcmask 588800  }
  0x16   : > { %v2583_v32 = vrot.slane %v2564_v22, %v488_v12  ;;  %v2586_v33 = vrot.slane %v2571_v25, %v450_v11  ;;  %v2590_v35 = vrot.slane %v2571_v25, %v488_v12  ;;  %v2593_v36 = vrot.slane %v2576_v26, %v450_v11 }
  0x17   : > { %v2596_v37 = vrot.slane %v2576_v26, %v488_v12  ;;  %v2611_v57 = vrot.slane %v2551_v13, %v526_v41  ;;  %v2614_v58 = vrot.slane %v2551_v13, %v564_v43  ;;  %v2621_v6 = vrot.slane %v2576_v26, %v526_v41 }
  0x18   : > { %v602_v12 = vsub.s32 5, %v2544_v10  ;;  %vm1325_vm9 = vcmask 130048   ;;  %vm1615_vm10 = vcmask 523264   ;;  %vm1765_vm11 = vcmask 519168  }
  0x19   : > { %473 = vrot.lane.b32.xlu1 %v2469_v2, %s2370_s28  ;;  %435 = vrot.lane.b32.xlu0 %v2469_v2, %s2371_s29  ;;  %vm1814_vm12 = vcmask 1041409   ;;  %vm1817_vm13 = vcmask 1042434   ;;  %vm1820_vm14 = vcmask 1043459   ;;  %vm1823_vm15 = vcmask 1044484  }
  0x1d   : > { %437 = vrot.lane.b32.xlu1 %v2475_v3, %s2371_s29  ;;  %427 = vrot.lane.b32.xlu0 %v2477_v4, %s2371_s29 }
  0x21   : > { %475 = vrot.lane.b32.xlu1 %v2475_v3, %s2370_s28  ;;  %468 = vrot.lane.b32.xlu0 %v2477_v4, %s2370_s28 }
  0x25   : > { %511 = vrot.lane.b32.xlu1 %v2469_v2, %s2372_s30  ;;  %509 = vrot.lane.b32.xlu0 %v2463_v1, %s2372_s30 }
  0x29   : > { %549 = vrot.lane.b32.xlu1 %v2469_v2, %s2373_s13  ;;  %547 = vrot.lane.b32.xlu0 %v2463_v1, %s2373_s13 }
  0x2d   : > { %513 = vrot.lane.b32.xlu1 %v2475_v3, %s2372_s30  ;;  %506 = vrot.lane.b32.xlu0 %v2477_v4, %s2372_s30 }
  0x31   : > { %551 = vrot.lane.b32.xlu1 %v2475_v3, %s2373_s13  ;;  %544 = vrot.lane.b32.xlu0 %v2477_v4, %s2373_s13 }
  0x35   : > { %586 = vrot.lane.b32.xlu1 %v2475_v3, %s2374_s14  ;;  %584 = vrot.lane.b32.xlu0 %v2469_v2, %s2374_s14 }
  0x39   : > { %588 = vrot.lane.b32.xlu1 %v2477_v4, %s2374_s14  ;;  %582 = vrot.lane.b32.xlu0 %v2463_v1, %s2374_s14 }
  0x3d   : > { %624 = vrot.lane.b32.xlu1 %v2475_v3, %s2375_s15  ;;  %622 = vrot.lane.b32.xlu0 %v2469_v2, %s2375_s15 }
  0x41   : > { %662 = vrot.lane.b32.xlu1 %v2475_v3, %s2376_s16  ;;  %660 = vrot.lane.b32.xlu0 %v2469_v2, %s2376_s16 }
  0x45   : > { %626 = vrot.lane.b32.xlu1 %v2477_v4, %s2375_s15  ;;  %620 = vrot.lane.b32.xlu0 %v2463_v1, %s2375_s15 }
  0x49   : > { %664 = vrot.lane.b32.xlu1 %v2477_v4, %s2376_s16  ;;  %658 = vrot.lane.b32.xlu0 %v2463_v1, %s2376_s16 }
  0x4d   : > { %700 = vrot.lane.b32.xlu1 %v2475_v3, %s2378_s17  ;;  %698 = vrot.lane.b32.xlu0 %v2469_v2, %s2378_s17 }
  0x51   : > { %702 = vrot.lane.b32.xlu1 %v2477_v4, %s2378_s17  ;;  %696 = vrot.lane.b32.xlu0 %v2463_v1, %s2378_s17 }
  0x55   : > { %740 = vperm.xlu0 %2351, %v736_v7   ;;  %745 = vperm.xlu1 %2352, %v737_v8  }
  0x87   : > { %v472_v14 = vpop.permute.xlu1 %471  ;;  %v434_v15 = vpop.permute.xlu0 %433 }
  0x8b   : > { %v474_v18 = vpop.permute.xlu1 %473  ;;  %v436_v19 = vpop.permute.xlu0 %435 }
  0x8c   : > { %v440_v20 = vsel %vm439_vm0, %v434_v15, %v436_v19  ;;  %v478_v21 = vsel %vm477_vm1, %v472_v14, %v474_v18 }
  0x8d   : > { %v465_v23 = vmul.f32 %v2554_v16, %v440_v20  ;;  %v503_v24 = vmul.f32 %v2557_v17, %v478_v21  ;;  %v2633_v20 = vrot.slane %v2576_v26, %v564_v43  ;;  %v2636_v21 = vrot.slane %v2564_v22, %v564_v43 }
  0x8f   : > { %v438_v27 = vpop.permute.xlu1 %437  ;;  %v428_v28 = vpop.permute.xlu0 %427  ;;  %v2164_v29 = vpack.c.bf16 %v503_v24, %v465_v23  ;;  %v2639_v23 = vrot.slane %v2571_v25, %v564_v43 }
  0x90   : > { %v447_v31 = vsel %vm439_vm0, %v428_v28, %v434_v15  ;;  %v442_v34 = vsel %vm439_vm0, %v438_v27, %v428_v28  ;;  %v441_v38 = vsel %vm439_vm0, %v436_v19, %v438_v27  ;;  %v2626_v15 = vrot.slane %v2564_v22, %v526_v41 }
  0x91   : > { %2165 = vmatprep.subr.bf16.mxu0 %v2164_v29  ;;  %v464_v42 = vmul.f32 %v2579_v30, %v447_v31  ;;  %v467_v46 = vmul.f32 %v2586_v33, %v442_v34  ;;  %v466_v50 = vmul.f32 %v2593_v36, %v441_v38  ;;  %v2644_v31 = vrot.slane %v2551_v13, %v602_v12 }
  0x93   : > { %v476_v39 = vpop.permute.xlu1 %475  ;;  %v469_v40 = vpop.permute.xlu0 %468  ;;  %3503 = vst [vmem:[#allocation4_spill] sm:$0xff] %v2644_v31 }
  0x94   : > { %v479_v44 = vsel %vm477_vm1, %v474_v18, %v476_v39  ;;  %v485_v45 = vsel %vm477_vm1, %v469_v40, %v472_v14  ;;  %v480_v47 = vsel %vm477_vm1, %v476_v39, %v469_v40  ;;  %v2629_v18 = vrot.slane %v2571_v25, %v526_v41 }
  0x95   : > { %v502_v48 = vmul.f32 %v2583_v32, %v485_v45  ;;  %v505_v49 = vmul.f32 %v2590_v35, %v480_v47  ;;  %v504_v51 = vmul.f32 %v2596_v37, %v479_v44 }
  0x97   : > { %v512_v52 = vpop.permute.xlu1 %511  ;;  %v510_v53 = vpop.permute.xlu0 %509  ;;  %v2166_v54 = vpack.c.bf16 %v502_v48, %v464_v42  ;;  %v2180_v55 = vpack.c.bf16 %v505_v49, %v467_v46  ;;  %v2182_v56 = vpack.c.bf16 %v504_v51, %v466_v50  ;;  %v2656_v51 = vrot.slane %v2576_v26, %v602_v12 }
  0x98   : > { %v516_v59 = vsel %vm515_vm2, %v510_v53, %v512_v52 }
  0x99   : > { %2167 = vmatpush1.bf16.msra.mxu0 %v2166_v54  ;;  %2181 = vmatprep.subr.bf16.mxu1 %v2180_v55  ;;  %v541_v63 = vmul.f32 %v2611_v57, %v516_v59  ;;  %3504 = vst [vmem:[#allocation5_spill] sm:$0xff] %v2656_v51  ;;  %v2663_v54 = vrot.slane %v2571_v25, %v602_v12 }
  0x9a   : > { %2183 = vmatpush1.bf16.msra.mxu1 %v2182_v56 }
  0x9b   : > { %v550_v60 = vpop.permute.xlu1 %549  ;;  %v548_v61 = vpop.permute.xlu0 %547  ;;  %3506 = vst [vmem:[#allocation7_spill] sm:$0xff] %v2663_v54 }
  0x9c   : > { %v554_v62 = vsel %vm553_vm3, %v548_v61, %v550_v60 }
  0x9d   : > { %v579_v0 = vmul.f32 %v2614_v58, %v554_v62 }
  0x9f   : > { %v514_v7 = vpop.permute.xlu1 %513  ;;  %v507_v8 = vpop.permute.xlu0 %506  ;;  %v2168_v11 = vpack.c.bf16 %v579_v0, %v541_v63  ;;  %v640_v63 = vsub.s32 6, %v2544_v10 }
  0xa0   : > { %v517_v14 = vsel %vm515_vm2, %v512_v52, %v514_v7  ;;  %v523_v19 = vsel %vm515_vm2, %v507_v8, %v510_v53  ;;  %v518_v24 = vsel %vm515_vm2, %v514_v7, %v507_v8  ;;  %v2660_v53 = vrot.slane %v2564_v22, %v602_v12 }
  0xa1   : > { %2169 = vmatprep.subr.bf16.mxu0 %v2168_v11  ;;  %v542_v27 = vmul.f32 %v2621_v6, %v517_v14  ;;  %v540_v34 = vmul.f32 %v2626_v15, %v523_v19  ;;  %v543_v41 = vmul.f32 %v2629_v18, %v518_v24  ;;  %v678_v11 = vsub.s32 7, %v2544_v10 }
  0xa2   : > { %3505 = vst [vmem:[#allocation6_spill] sm:$0xff] %v2660_v53 }
  0xa3   : > { %v552_v28 = vpop.permute.xlu1 %551  ;;  %v545_v29 = vpop.permute.xlu0 %544 }
  0xa4   : > { %v555_v38 = vsel %vm553_vm3, %v550_v60, %v552_v28  ;;  %v556_v39 = vsel %vm553_vm3, %v552_v28, %v545_v29  ;;  %v561_v40 = vsel %vm553_vm3, %v545_v29, %v548_v61  ;;  %v2681_v28 = vrot.slane %v2551_v13, %v678_v11 }
  0xa5   : > { %v580_v42 = vmul.f32 %v2633_v20, %v555_v38  ;;  %v578_v43 = vmul.f32 %v2636_v21, %v561_v40  ;;  %v581_v44 = vmul.f32 %v2639_v23, %v556_v39  ;;  %v2688_v38 = vrot.slane %v2576_v26, %v640_v63 }
  0xa6   : > { %3508 = vst [vmem:[#allocation9_spill] sm:$0xff] %v2681_v28 }
  0xa7   : > { %v587_v45 = vpop.permute.xlu1 %586  ;;  %v585_v46 = vpop.permute.xlu0 %584  ;;  %v2170_v47 = vpack.c.bf16 %v578_v43, %v540_v34  ;;  %v2184_v48 = vpack.c.bf16 %v581_v44, %v543_v41  ;;  %v2186_v49 = vpack.c.bf16 %v580_v42, %v542_v27  ;;  %v2678_v27 = vrot.slane %v2551_v13, %v640_v63  ;;  %3509 = vst [vmem:[#allocation10_spill] sm:$0xff] %v2688_v38 }
  0xa8   : > { %v592_v50 = vsel %vm590_vm4, %v585_v46, %v587_v45  ;;  %v2692_v42 = vrot.slane %v2564_v22, %v640_v63  ;;  %v2695_v43 = vrot.slane %v2571_v25, %v640_v63 }
  0xa9   : > { %v617_v52 = vmul.f32 %v2644_v31, %v592_v50  ;;  %2171 = vmatpush1.bf16.msra.mxu0 %v2170_v47  ;;  %2185 = vmatprep.subr.bf16.mxu1 %v2184_v48  ;;  %3507 = vst [vmem:[#allocation8_spill] sm:$0xff] %v2678_v27  ;;  %v2705_v47 = vrot.slane %v2571_v25, %v678_v11 }
  0xaa   : > { %2187 = vmatpush1.bf16.msra.mxu1 %v2186_v49  ;;  %3510 = vst [vmem:[#allocation11_spill] sm:$0xff] %v2692_v42  ;;  %3511 = vst [vmem:[#allocation12_spill] sm:$0xff] %v2695_v43 }
  0xab   : > { %v589_v55 = vpop.permute.xlu1 %588  ;;  %v583_v56 = vpop.permute.xlu0 %582  ;;  %v2172_v59 = vpack.c.bf16 %v617_v52, %v2469_v2  ;;  %3514 = vst [vmem:[#allocation15_spill] sm:$0xff] %v2705_v47 }
  0xac   : > { %v593_v60 = vsel %vm590_vm4, %v587_v45, %v589_v55  ;;  %v591_v61 = vsel %vm590_vm4, %v583_v56, %v585_v46  ;;  %v599_v62 = vsel %vm590_vm4, %v589_v55, %v583_v56  ;;  %v2699_v45 = vrot.slane %v2576_v26, %v678_v11 }
  0xad   : > { %v618_v0 = vmul.f32 %v2656_v51, %v593_v60  ;;  %v616_v7 = vmul.f32 %v2660_v53, %v591_v61  ;;  %v619_v8 = vmul.f32 %v2663_v54, %v599_v62  ;;  %2173 = vmatprep.subr.bf16.mxu0 %v2172_v59  ;;  %v2702_v46 = vrot.slane %v2564_v22, %v678_v11  ;;  %v2720_v62 = vld [vmem:[%s3449_s1 + $0x28] ss:$0 sm:$0xff] }
  0xae   : > { %3512 = vst [vmem:[#allocation13_spill] sm:$0xff] %v2699_v45  ;;  %3515 = vst [vmem:[#allocation16_spill] sm:$0xff] %v2720_v62 }
  0xaf   : > { %v625_v12 = vpop.permute.xlu1 %624  ;;  %v623_v2 = vpop.permute.xlu0 %622  ;;  %v2174_v14 = vpack.c.bf16 %v616_v7, %v2463_v1  ;;  %v2188_v19 = vpack.c.bf16 %v619_v8, %v2477_v4  ;;  %v2190_v24 = vpack.c.bf16 %v618_v0, %v2475_v3  ;;  %3513 = vst [vmem:[#allocation14_spill] sm:$0xff] %v2702_v46 }
  0xb0   : > { %v630_v10 = vsel %vm628_vm5, %v623_v2, %v625_v12 }
  0xb1   : > { %2175 = vmatpush1.bf16.msra.mxu0 %v2174_v14  ;;  %2189 = vmatprep.subr.bf16.mxu1 %v2188_v19  ;;  %v655_v4 = vmul.f32 %v2678_v27, %v630_v10  ;;  %v2727_v14 = vld [vmem:[%s3449_s1 + $0x30] ss:$0 sm:$0xff]  ;;  %v2732_v19 = vld [vmem:[%s3449_s1 + $0x20] ss:$0 sm:$0xff] }
  0xb2   : > { %2191 = vmatpush1.bf16.msra.mxu1 %v2190_v24  ;;  %3516 = vst [vmem:[#allocation17_spill] sm:$0xff] %v2727_v14  ;;  %3517 = vst [vmem:[#allocation18_spill] sm:$0xff] %v2732_v19  ;;  %v2737_v24 = vld [vmem:[%s3449_s1 + $0x38] ss:$0 sm:$0xff] }
  0xb3   : > { %v663_v29 = vpop.permute.xlu1 %662  ;;  %v661_v34 = vpop.permute.xlu0 %660  ;;  %3518 = vst [vmem:[#allocation19_spill] sm:$0xff] %v2737_v24 }
  0xb4   : > { %v668_v1 = vsel %vm666_vm6, %v661_v34, %v663_v29 }
  0xb5   : > { %v693_v3 = vmul.f32 %v2681_v28, %v668_v1 }
  0xb7   : > { %v627_v39 = vpop.permute.xlu1 %626  ;;  %v621_v40 = vpop.permute.xlu0 %620  ;;  %v2176_v41 = vpack.c.bf16 %v693_v3, %v655_v4 }
  0xb8   : > { %v631_v13 = vsel %vm628_vm5, %v625_v12, %v627_v39  ;;  %v629_v44 = vsel %vm628_vm5, %v621_v40, %v623_v2  ;;  %v637_v48 = vsel %vm628_vm5, %v627_v39, %v621_v40 }
  0xb9   : > { %2177 = vmatprep.subr.bf16.mxu0 %v2176_v41  ;;  %v656_v49 = vmul.f32 %v2688_v38, %v631_v13  ;;  %v654_v55 = vmul.f32 %v2692_v42, %v629_v44  ;;  %v657_v22 = vmul.f32 %v2695_v43, %v637_v48  ;;  %v734_v41 = vld [vmem:[%s3450_s2] sm:$0xff]  ;;  %v735_v13 = vld [vmem:[%s3450_s2 + $0x8] sm:$0xff] }
  0xbb   : > { %v665_v50 = vpop.permute.xlu1 %664  ;;  %v659_v52 = vpop.permute.xlu0 %658 }
  0xbc   : > { %v669_v56 = vsel %vm666_vm6, %v663_v29, %v665_v50  ;;  %v667_v26 = vsel %vm666_vm6, %v659_v52, %v661_v34  ;;  %v675_v59 = vsel %vm666_vm6, %v665_v50, %v659_v52 }
  0xbd   : > { %v694_v25 = vmul.f32 %v2699_v45, %v669_v56  ;;  %v692_v60 = vmul.f32 %v2702_v46, %v667_v26  ;;  %v695_v61 = vmul.f32 %v2705_v47, %v675_v59 }
  0xbf   : > { %v701_v63 = vpop.permute.xlu1 %700  ;;  %v699_v0 = vpop.permute.xlu0 %698  ;;  %v2178_v7 = vpack.c.bf16 %v692_v60, %v654_v55  ;;  %v2192_v8 = vpack.c.bf16 %v695_v61, %v657_v22  ;;  %v2194_v11 = vpack.c.bf16 %v694_v25, %v656_v49 }
  0xc0   : > { %v706_v12 = vsel %vm704_vm7, %v699_v0, %v701_v63 }
  0xc1   : > { %v731_v2 = vmul.f32 %v2720_v62, %v706_v12  ;;  %2179 = vmatpush1.bf16.msra.mxu0 %v2178_v7  ;;  %2193 = vmatprep.subr.bf16.mxu1 %v2192_v8 }
  0xc2   : > { %2195 = vmatpush1.bf16.msra.mxu1 %v2194_v11 }
  0xc3   : > { %v703_v10 = vpop.permute.xlu1 %702  ;;  %771 = vmatprep.subr.mxu0 %v731_v2  ;;  %v697_v29 = vpop.permute.xlu0 %696 }
  0xc4   : > { %v707_v34 = vsel %vm704_vm7, %v701_v63, %v703_v10  ;;  %v705_v1 = vsel %vm704_vm7, %v697_v29, %v699_v0  ;;  %v713_v4 = vsel %vm704_vm7, %v703_v10, %v697_v29 }
  0xc5   : > { %v732_v3 = vmul.f32 %v2727_v14, %v707_v34  ;;  %v730_v39 = vmul.f32 %v2732_v19, %v705_v1  ;;  %v733_v40 = vmul.f32 %v2737_v24, %v713_v4 }
  0xc7   : > { %772 = vmatpush1.msra.mxu0 %v730_v39  ;;  %848 = vmatprep.subr.mxu1 %v733_v40  ;;  %v1262_v39 = vld [vmem:[%s3452_s4 + $0x8] sm:$0xff] }
  0xc8   : > { %2101 = vmatmul.mubr.msk.f32.vlgmr.msra.gmra.mrb[0].mxu0 %vm748_vm8, %v734_v41  ;;  %849 = vmatpush1.msra.mxu1 %v732_v3 }
  0xc9   : > { %2103 = vmatmul.mubr.msk.f32.vlgmr.msra.gmra.mrb[0].mxu1 %vm748_vm8, %v734_v41  ;;  %825 = vmatprep.mubr.f32.mxu0 %v3462_v5 }
  0xca   : > { %902 = vmatprep.mubr.f32.mxu1 %v3462_v5 }
  0xcc   : > { %2102 = vmatmul.mubr.msk.f32.gmra.mrb[2].mxu0 %vm748_vm8, %v735_v13 }
  0xcd   : > { %2104 = vmatmul.mubr.msk.f32.gmra.mrb[2].mxu1 %vm748_vm8, %v735_v13  ;;  %2105 = vmatprep.mubr.msk.f32.mxu0 %vm1325_vm9, %v1262_v39 }
  0xce   : > { %2113 = vmatprep.mubr.msk.f32.mxu1 %vm1325_vm9, %v1262_v39 }
  0xd4   : > { %v741_v44 = vpop.permute.xlu0 %740  ;;  %v746_v7 = vpop.permute.xlu1 %745 }
 0x19b   : > { %v821_v48 = vpop.f32.mrb[0].mxu0 }
 0x19c   : > { %v822_v49 = vadd.f32 %v821_v48, %v741_v44  ;;  %v823_v50 = vpop.f32.mrb[1].mxu0  ;;  %v898_v52 = vpop.f32.mrb[0].mxu1 }
 0x19d   : > { %v899_v55 = vadd.f32 %v898_v52, %v741_v44  ;;  %v900_v56 = vpop.f32.mrb[1].mxu1  ;;  %v824_v63 = vadd.f32 %v823_v50, %v741_v44  ;;  %v1277_v50 = vld [vmem:[%s3453_s5] sm:$0xff] }
 0x19e   : > { %v2753_v26 = vmax.f32 %v822_v49, 0.0  ;;  %v901_v12 = vadd.f32 %v900_v56, %v741_v44 }
 0x19f   : > { %v2755_v59 = vmax.f32 %v899_v55, 0.0  ;;  %v827_v22 = vpop.f32.mrb[2].mxu0  ;;  %v2769_v0 = vmax.f32 %v824_v63, 0.0  ;;  %v1278_v55 = vld [vmem:[%s3453_s5 + $0x8] sm:$0xff]  ;;  %v1281_v63 = vld [vmem:[%s3453_s5 + $0x20] sm:$0xff] }
 0x1a0   : > { %v829_v25 = vpop.f32.mrb[3].mxu0  ;;  %v904_v60 = vpop.f32.mrb[2].mxu1  ;;  %931 = vrot.lane.b32.xlu1 %v2753_v26, %s2371_s29  ;;  %v828_v2 = vadd.f32 %v827_v22, %v746_v7  ;;  %v2801_v10 = vmax.f32 %v901_v12, 0.0  ;;  %v1279_v22 = vld [vmem:[%s3453_s5 + $0x10] sm:$0xff] }
 0x1a1   : > { %v906_v61 = vpop.f32.mrb[3].mxu1  ;;  %1097 = vrot.lane.b32.xlu0 %v2755_v59, %s2374_s14  ;;  %v905_v8 = vadd.f32 %v904_v60, %v746_v7  ;;  %v830_v34 = vadd.f32 %v829_v25, %v746_v7  ;;  %v1280_v60 = vld [vmem:[%s3453_s5 + $0x18] sm:$0xff] }
 0x1a2   : > { %v2803_v29 = vmax.f32 %v828_v2, 0.0  ;;  %v907_v4 = vadd.f32 %v906_v61, %v746_v7  ;;  %v1283_v2 = vld [vmem:[%s3453_s5 + $0x30] sm:$0xff] }
 0x1a3   : > { %v2787_v11 = vmax.f32 %v905_v8, 0.0  ;;  %v2825_v1 = vmax.f32 %v830_v34, 0.0  ;;  %v1282_v8 = vld [vmem:[%s3453_s5 + $0x28] sm:$0xff] }
 0x1a4   : > { %973 = vrot.lane.b32.xlu1 %v2753_v26, %s2370_s28  ;;  %v2831_v3 = vmax.f32 %v907_v4, 0.0  ;;  %v1284_v4 = vld [vmem:[%s3453_s5 + $0x38] sm:$0xff] }
 0x1a5   : > { %1139 = vrot.lane.b32.xlu0 %v2755_v59, %s2375_s15 }
 0x1a8   : > { %1015 = vrot.lane.b32.xlu1 %v2753_v26, %s2372_s30 }
 0x1a9   : > { %1181 = vrot.lane.b32.xlu0 %v2755_v59, %s2376_s16 }
 0x1ac   : > { %1057 = vrot.lane.b32.xlu1 %v2753_v26, %s2373_s13 }
 0x1ad   : > { %933 = vrot.lane.b32.xlu0 %v2769_v0, %s2371_s29 }
 0x1b0   : > { %935 = vrot.lane.b32.xlu1 %v2755_v59, %s2371_s29 }
 0x1b1   : > { %975 = vrot.lane.b32.xlu0 %v2769_v0, %s2370_s28 }
 0x1b4   : > { %977 = vrot.lane.b32.xlu1 %v2755_v59, %s2370_s28 }
 0x1b5   : > { %1017 = vrot.lane.b32.xlu0 %v2769_v0, %s2372_s30 }
 0x1b8   : > { %1093 = vrot.lane.b32.xlu1 %v2753_v26, %s2374_s14 }
 0x1b9   : > { %1059 = vrot.lane.b32.xlu0 %v2769_v0, %s2373_s13 }
 0x1bc   : > { %1019 = vrot.lane.b32.xlu1 %v2755_v59, %s2372_s30 }
 0x1bd   : > { %941 = vrot.lane.b32.xlu0 %v2787_v11, %s2371_s29 }
 0x1c0   : > { %1135 = vrot.lane.b32.xlu1 %v2753_v26, %s2375_s15 }
 0x1c1   : > { %983 = vrot.lane.b32.xlu0 %v2787_v11, %s2370_s28 }
 0x1c4   : > { %1061 = vrot.lane.b32.xlu1 %v2755_v59, %s2373_s13 }
 0x1c5   : > { %1105 = vrot.lane.b32.xlu0 %v2787_v11, %s2374_s14 }
 0x1c8   : > { %919 = vrot.lane.b32.xlu1 %v2801_v10, %s2371_s29 }
 0x1c9   : > { %1101 = vrot.lane.b32.xlu0 %v2803_v29, %s2374_s14 }
 0x1cc   : > { %967 = vrot.lane.b32.xlu1 %v2801_v10, %s2370_s28 }
 0x1cd   : > { %1025 = vrot.lane.b32.xlu0 %v2787_v11, %s2372_s30 }
 0x1d0   : > { %1009 = vrot.lane.b32.xlu1 %v2801_v10, %s2372_s30 }
 0x1d1   : > { %1147 = vrot.lane.b32.xlu0 %v2787_v11, %s2375_s15 }
 0x1d4   : > { %1051 = vrot.lane.b32.xlu1 %v2801_v10, %s2373_s13 }
 0x1d5   : > { %1143 = vrot.lane.b32.xlu0 %v2803_v29, %s2375_s15 }
 0x1d8   : > { %1095 = vrot.lane.b32.xlu1 %v2769_v0, %s2374_s14 }
 0x1d9   : > { %1067 = vrot.lane.b32.xlu0 %v2787_v11, %s2373_s13 }
 0x1dc   : > { %1137 = vrot.lane.b32.xlu1 %v2769_v0, %s2375_s15 }
 0x1dd   : > { %939 = vrot.lane.b32.xlu0 %v2825_v1, %s2371_s29 }
 0x1e0   : > { %1179 = vrot.lane.b32.xlu1 %v2769_v0, %s2376_s16 }
 0x1e1   : > { %921 = vrot.lane.b32.xlu0 %v2831_v3, %s2371_s29 }
 0x1e4   : > { %937 = vrot.lane.b32.xlu1 %v2803_v29, %s2371_s29  ;;  %s2380_s29 = smov 64  }
 0x1e5   : > { %981 = vrot.lane.b32.xlu0 %v2825_v1, %s2370_s28 }
 0x1e8   : > { %979 = vrot.lane.b32.xlu1 %v2803_v29, %s2370_s28 }
 0x1e9   : > { %969 = vrot.lane.b32.xlu0 %v2831_v3, %s2370_s28 }
 0x1ec   : > { %1021 = vrot.lane.b32.xlu1 %v2803_v29, %s2372_s30 }
 0x1ed   : > { %1023 = vrot.lane.b32.xlu0 %v2825_v1, %s2372_s30 }
 0x1f0   : > { %1063 = vrot.lane.b32.xlu1 %v2803_v29, %s2373_s13 }
 0x1f1   : > { %1011 = vrot.lane.b32.xlu0 %v2831_v3, %s2372_s30 }
 0x1f4   : > { %1177 = vrot.lane.b32.xlu1 %v2753_v26, %s2376_s16 }
 0x1f5   : > { %1065 = vrot.lane.b32.xlu0 %v2825_v1, %s2373_s13 }
 0x1f8   : > { %1221 = vrot.lane.b32.xlu1 %v2769_v0, %s2378_s17 }
 0x1f9   : > { %1053 = vrot.lane.b32.xlu0 %v2831_v3, %s2373_s13 }
 0x1fc   : > { %1219 = vrot.lane.b32.xlu1 %v2753_v26, %s2378_s17 }
 0x1fd   : > { %1189 = vrot.lane.b32.xlu0 %v2787_v11, %s2376_s16 }
 0x200   : > { %1103 = vrot.lane.b32.xlu1 %v2825_v1, %s2374_s14 }
 0x201   : > { %1185 = vrot.lane.b32.xlu0 %v2803_v29, %s2376_s16 }
 0x204   : > { %1145 = vrot.lane.b32.xlu1 %v2825_v1, %s2375_s15 }
 0x205   : > { %1223 = vrot.lane.b32.xlu0 %v2755_v59, %s2378_s17 }
 0x208   : > { %1187 = vrot.lane.b32.xlu1 %v2825_v1, %s2376_s16 }
 0x209   : > { %1231 = vrot.lane.b32.xlu0 %v2787_v11, %s2378_s17 }
 0x20c   : > { %1229 = vrot.lane.b32.xlu1 %v2825_v1, %s2378_s17 }
 0x20d   : > { %1227 = vrot.lane.b32.xlu0 %v2803_v29, %s2378_s17 }
 0x210   : > { %1099 = vrot.lane.b32.xlu1 %v2801_v10, %s2374_s14 }
 0x211   : > { %1107 = vrot.lane.b32.xlu0 %v2831_v3, %s2374_s14 }
 0x212   : > { %v2890_v40 = vpop.permute.xlu1 %931 }
 0x213   : > { %v2892_v41 = vpop.permute.xlu0 %1097 }
 0x214   : > { %1141 = vrot.lane.b32.xlu1 %v2801_v10, %s2375_s15 }
 0x215   : > { %1149 = vrot.lane.b32.xlu0 %v2831_v3, %s2375_s15  ;;  %s2096_s15 = sshll.u32 %s3552_s24, 3 }
 0x216   : > { %v2898_v13 = vpop.permute.xlu1 %973  ;;  %s413_s26 = scalar_lea.vmem %s3460_s12, %s2096_s15 }
 0x217   : > { %v2900_v44 = vpop.permute.xlu0 %1139 }
 0x218   : > { %3519 = vst [vmem:[#allocation20_spill] sm:$0xff] %v2900_v44  ;;  %1183 = vrot.lane.b32.xlu1 %v2801_v10, %s2376_s16 }
 0x219   : > { %1191 = vrot.lane.b32.xlu0 %v2831_v3, %s2376_s16 }
 0x21a   : > { %v2906_v48 = vpop.permute.xlu1 %1015 }
 0x21b   : > { %v2908_v49 = vpop.permute.xlu0 %1181 }
 0x21c   : > { %3520 = vst [vmem:[#allocation21_spill] sm:$0xff] %v2908_v49  ;;  %1225 = vrot.lane.b32.xlu1 %v2801_v10, %s2378_s17 }
 0x21d   : > { %1233 = vrot.lane.b32.xlu0 %v2831_v3, %s2378_s17 }
 0x21e   : > { %v2917_v52 = vpop.permute.xlu1 %1057 }
 0x21f   : > { %v934_v56 = vpop.permute.xlu0 %933 }
 0x220   : > { %1287 = vperm.xlu1 %2352, %v1277_v50   ;;  %v1609_v50 = vld [vmem:[%s3455_s7] sm:$0xf]  ;;  %v943_v28 = vsel %vm439_vm0, %v2890_v40, %v934_v56 }
 0x221   : > { %1292 = vperm.xlu0 %2351, %v1278_v55  }
 0x222   : > { %v936_v25 = vpop.permute.xlu1 %935 }
 0x223   : > { %v2928_v61 = vpop.permute.xlu0 %975  ;;  %v944_v49 = vsel %vm439_vm0, %v934_v56, %v936_v25 }
 0x224   : > { %1297 = vperm.xlu1 %2352, %v1279_v22   ;;  %v985_v56 = vsel %vm477_vm1, %v2898_v13, %v2928_v61 }
 0x225   : > { %1302 = vperm.xlu0 %2351, %v1280_v60  }
 0x226   : > { %v2933_v7 = vpop.permute.xlu1 %977 }
 0x227   : > { %v2938_v12 = vpop.permute.xlu0 %1017 }
 0x228   : > { %1307 = vperm.xlu1 %2352, %v1281_v63  }
 0x229   : > { %1312 = vperm.xlu0 %2351, %v1282_v8  }
 0x22a   : > { %v2943_v34 = vpop.permute.xlu1 %1093 }
 0x22b   : > { %v2948_v39 = vpop.permute.xlu0 %1059 }
 0x22c   : > { %1317 = vperm.xlu1 %2352, %v1283_v2  }
 0x22d   : > { %1322 = vperm.xlu0 %2351, %v1284_v4  }
 0x22e   : > { %v2953_v55 = vpop.permute.xlu1 %1019 }
 0x22f   : > { %v942_v22 = vpop.permute.xlu0 %941 }
 0x230   : > { %1612 = vperm.xlu1 %2352, %v1609_v50  }
 0x232   : > { %v2955_v60 = vpop.permute.xlu1 %1135 }
 0x233   : > { %3521 = vst [vmem:[#allocation22_spill] sm:$0xff] %v2955_v60  ;;  %v984_v63 = vpop.permute.xlu0 %983 }
 0x236   : > { %v2957_v8 = vpop.permute.xlu1 %1061 }
 0x237   : > { %v2959_v9 = vpop.permute.xlu0 %1105 }
 0x23a   : > { %v920_v5 = vpop.permute.xlu1 %919 }
 0x23b   : > { %v2961_v24 = vpop.permute.xlu0 %1101  ;;  %v945_v62 = vsel %vm439_vm0, %v936_v25, %v920_v5 }
 0x23c   : > { %v962_v44 = vmul.f32 %v945_v62, %v2586_v33 }
 0x23e   : > { %v968_v2 = vpop.permute.xlu1 %967 }
 0x23f   : > { %v2963_v4 = vpop.permute.xlu0 %1025 }
 0x242   : > { %v2965_v14 = vpop.permute.xlu1 %1009 }
 0x243   : > { %v2967_v47 = vpop.permute.xlu0 %1147 }
 0x244   : > { %3522 = vst [vmem:[#allocation23_spill] sm:$0xff] %v2967_v47 }
 0x246   : > { %v2969_v45 = vpop.permute.xlu1 %1051 }
 0x247   : > { %v2971_v50 = vpop.permute.xlu0 %1143 }
 0x248   : > { %3523 = vst [vmem:[#allocation24_spill] sm:$0xff] %v2971_v50  ;;  %v957_v50 = vsel %vm439_vm0, %v920_v5, %v2890_v40 }
 0x249   : > { %v959_v5 = vmul.f32 %v957_v50, %v2579_v30 }
 0x24a   : > { %v2973_v43 = vpop.permute.xlu1 %1095 }
 0x24b   : > { %v2975_v38 = vpop.permute.xlu0 %1067 }
 0x24e   : > { %v2977_v54 = vpop.permute.xlu1 %1137 }
 0x24f   : > { %3524 = vst [vmem:[#allocation25_spill] sm:$0xff] %v2977_v54  ;;  %v940_v51 = vpop.permute.xlu0 %939  ;;  %v960_v54 = vmul.f32 %v943_v28, %v2554_v16 }
 0x250   : > { %v947_v19 = vsel %vm439_vm0, %v940_v51, %v942_v22 }
 0x251   : > { %v965_v42 = vmul.f32 %v947_v19, %v2593_v36 }
 0x252   : > { %v2981_v46 = vpop.permute.xlu1 %1179 }
 0x253   : > { %3525 = vst [vmem:[#allocation26_spill] sm:$0xff] %v2981_v46  ;;  %v922_v27 = vpop.permute.xlu0 %921  ;;  %v961_v46 = vmul.f32 %v944_v49, %v2593_v36 }
 0x254   : > { %v948_v47 = vsel %vm439_vm0, %v942_v22, %v922_v27 }
 0x255   : > { %v966_v60 = vmul.f32 %v948_v47, %v2586_v33  ;;  %v2234_v62 = vpack.c.bf16 %v965_v42, %v961_v46  ;;  %v987_v47 = vsel %vm477_vm1, %v2933_v7, %v968_v2 }
 0x256   : > { %v938_v31 = vpop.permute.xlu1 %937 }
 0x257   : > { %v946_v19 = vsel %vm439_vm0, %v938_v31, %v940_v51  ;;  %v958_v25 = vsel %vm439_vm0, %v922_v27, %v938_v31  ;;  %v982_v22 = vpop.permute.xlu0 %981  ;;  %v2232_v53 = vpack.c.bf16 %v966_v60, %v962_v44  ;;  %v999_v51 = vsel %vm477_vm1, %v968_v2, %v2898_v13 }
 0x258   : > { %v963_v33 = vmul.f32 %v958_v25, %v2579_v30  ;;  %v964_v28 = vmul.f32 %v946_v19, %v2554_v16  ;;  %v989_v36 = vsel %vm477_vm1, %v982_v22, %v984_v63  ;;  %v1002_v44 = vmul.f32 %v985_v56, %v2557_v17 }
 0x259   : > { %2233 = vmatprep.subr.bf16.mxu1 %v2232_v53  ;;  %v986_v30 = vsel %vm477_vm1, %v2928_v61, %v2933_v7  ;;  %v1007_v53 = vmul.f32 %v989_v36, %v2596_v37  ;;  %v1004_v60 = vmul.f32 %v987_v47, %v2590_v35  ;;  %v1028_v36 = vsel %vm515_vm2, %v2938_v12, %v2953_v55 }
 0x25a   : > { %v2198_v40 = vpack.c.bf16 %v963_v33, %v959_v5  ;;  %2235 = vmatpush1.bf16.msra.mxu1 %v2234_v62  ;;  %v980_v31 = vpop.permute.xlu1 %979  ;;  %v2196_v27 = vpack.c.bf16 %v964_v28, %v960_v54  ;;  %v1001_v54 = vmul.f32 %v999_v51, %v2583_v32  ;;  %v1003_v7 = vmul.f32 %v986_v30, %v2596_v37 }
 0x25b   : > { %v988_v16 = vsel %vm477_vm1, %v980_v31, %v982_v22  ;;  %v970_v42 = vpop.permute.xlu0 %969  ;;  %v1029_v62 = vsel %vm515_vm2, %v2953_v55, %v2965_v14  ;;  %v1041_v33 = vsel %vm515_vm2, %v2965_v14, %v2906_v48  ;;  %v1045_v55 = vmul.f32 %v1028_v36, %v2621_v6  ;;  %v3528_v36 = vld [vmem:[#allocation25_spill] sm:$0xff] }
 0x25c   : > { %v1006_v46 = vmul.f32 %v988_v16, %v2557_v17  ;;  %v990_v49 = vsel %vm477_vm1, %v984_v63, %v970_v42  ;;  %v1000_v13 = vsel %vm477_vm1, %v970_v42, %v980_v31  ;;  %2197 = vmatprep.subr.bf16.mxu0 %v2196_v27  ;;  %v1027_v17 = vsel %vm515_vm2, %v2906_v48, %v2938_v12 }
 0x25d   : > { %v1005_v2 = vmul.f32 %v1000_v13, %v2583_v32  ;;  %v1008_v61 = vmul.f32 %v990_v49, %v2590_v35  ;;  %2199 = vmatpush1.bf16.msra.mxu0 %v2198_v40  ;;  %v2238_v22 = vpack.c.bf16 %v1007_v53, %v1003_v7  ;;  %v1044_v32 = vmul.f32 %v1027_v17, %v2611_v57 }
 0x25e   : > { %v1022_v50 = vpop.permute.xlu1 %1021  ;;  %v2200_v63 = vpack.c.bf16 %v1006_v46, %v1002_v44  ;;  %v1043_v27 = vmul.f32 %v1041_v33, %v2626_v15  ;;  %v1046_v44 = vmul.f32 %v1029_v62, %v2629_v18  ;;  %v1069_v12 = vsel %vm553_vm3, %v2917_v52, %v2948_v39 }
 0x25f   : > { %v2202_v56 = vpack.c.bf16 %v1005_v2, %v1001_v54  ;;  %v1024_v19 = vpop.permute.xlu0 %1023  ;;  %v2236_v25 = vpack.c.bf16 %v1008_v61, %v1004_v60  ;;  %v1086_v49 = vmul.f32 %v1069_v12, %v2614_v58  ;;  %v1083_v13 = vsel %vm553_vm3, %v2969_v45, %v2917_v52 }
 0x260   : > { %v1030_v5 = vsel %vm515_vm2, %v1022_v50, %v1024_v19  ;;  %2201 = vmatprep.subr.bf16.mxu0 %v2200_v63  ;;  %v1031_v35 = vsel %vm515_vm2, %v1024_v19, %v2963_v4  ;;  %v1070_v60 = vsel %vm553_vm3, %v2948_v39, %v2957_v8  ;;  %vm1826_vm0 = vcmask 1045509  }
 0x261   : > { %v1048_v37 = vmul.f32 %v1030_v5, %v2611_v57  ;;  %2203 = vmatpush1.bf16.msra.mxu0 %v2202_v56  ;;  %2237 = vmatprep.subr.bf16.mxu1 %v2236_v25  ;;  %v1049_v57 = vmul.f32 %v1031_v35, %v2621_v6  ;;  %v1071_v6 = vsel %vm553_vm3, %v2957_v8, %v2969_v45  ;;  %vm1829_vm1 = vcmask 1046534  }
 0x262   : > { %2239 = vmatpush1.bf16.msra.mxu1 %v2238_v22  ;;  %v1064_v28 = vpop.permute.xlu1 %1063  ;;  %v1088_v45 = vmul.f32 %v1071_v6, %v2639_v23  ;;  %v1087_v39 = vmul.f32 %v1070_v60, %v2633_v20  ;;  %v2212_v22 = vpack.c.bf16 %v2825_v1, %v2769_v0  ;;  %v1109_v5 = vsel %vm590_vm4, %v2943_v34, %v2973_v43 }
 0x263   : > { %v1012_v47 = vpop.permute.xlu0 %1011  ;;  %v2204_v51 = vpack.c.bf16 %v1048_v37, %v1044_v32  ;;  %v2242_v53 = vpack.c.bf16 %v1049_v57, %v1045_v55  ;;  %v2250_v35 = vpack.c.bf16 %v2787_v11, %v2755_v59  ;;  %v3526_v37 = vld [vmem:[#allocation6_spill] sm:$0xff]  ;;  %v3530_v57 = vld [vmem:[#allocation20_spill] sm:$0xff] }
 0x264   : > { %v1032_v40 = vsel %vm515_vm2, %v2963_v4, %v1012_v47  ;;  %v1042_v31 = vsel %vm515_vm2, %v1012_v47, %v1022_v50  ;;  %v1085_v50 = vmul.f32 %v1083_v13, %v2636_v21  ;;  %v3529_v47 = vld [vmem:[#allocation22_spill] sm:$0xff]  ;;  %v3534_v55 = vld [vmem:[#allocation8_spill] sm:$0xff]  ;;  %vm1832_vm2 = vcmask 1047559  }
 0x265   : > { %v1047_v14 = vmul.f32 %v1042_v31, %v2626_v15  ;;  %v1050_v48 = vmul.f32 %v1032_v40, %v2629_v18  ;;  %2205 = vmatprep.subr.bf16.mxu0 %v2204_v51  ;;  %v1151_v51 = vsel %vm628_vm5, %v3529_v47, %v3528_v36  ;;  %v1152_v40 = vsel %vm628_vm5, %v3528_v36, %v3530_v57 }
 0x266   : > { %v3050_v30 = vpop.permute.xlu1 %1177 }
 0x267   : > { %v2206_v4 = vpack.c.bf16 %v1047_v14, %v1043_v27  ;;  %v1066_v16 = vpop.permute.xlu0 %1065  ;;  %v2240_v42 = vpack.c.bf16 %v1050_v48, %v1046_v44  ;;  %v3532_v27 = vld [vmem:[#allocation23_spill] sm:$0xff] }
 0x268   : > { %v1072_v46 = vsel %vm553_vm3, %v1064_v28, %v1066_v16  ;;  %v1073_v15 = vsel %vm553_vm3, %v1066_v16, %v2975_v38  ;;  %v3533_v48 = vld [vmem:[#allocation11_spill] sm:$0xff] }
 0x269   : > { %v1090_v18 = vmul.f32 %v1072_v46, %v2614_v58  ;;  %2207 = vmatpush1.bf16.msra.mxu0 %v2206_v4  ;;  %2241 = vmatprep.subr.bf16.mxu1 %v2240_v42  ;;  %v1091_v58 = vmul.f32 %v1073_v15, %v2633_v20  ;;  %v2248_v20 = vpack.c.bf16 %v2831_v3, %v2801_v10  ;;  %v3527_v3 = vld [vmem:[#allocation4_spill] sm:$0xff]  ;;  %v3536_v46 = vld [vmem:[#allocation26_spill] sm:$0xff] }
 0x26a   : > { %2243 = vmatpush1.bf16.msra.mxu1 %v2242_v53  ;;  %v3063_v54 = vpop.permute.xlu1 %1221  ;;  %v1127_v10 = vmul.f32 %v1109_v5, %v3526_v37  ;;  %v1169_v12 = vmul.f32 %v1151_v51, %v3533_v48  ;;  %v1170_v4 = vmul.f32 %v1152_v40, %v3534_v55  ;;  %v3535_v53 = vld [vmem:[#allocation21_spill] sm:$0xff]  ;;  %v1193_v15 = vsel %vm666_vm6, %v3050_v30, %v3536_v46  ;;  %v3542_v51 = vld [vmem:[#allocation7_spill] sm:$0xff] }
 0x26b   : > { %v1054_v2 = vpop.permute.xlu0 %1053  ;;  %v2208_v61 = vpack.c.bf16 %v1090_v18, %v1086_v49  ;;  %v1194_v49 = vsel %vm666_vm6, %v3536_v46, %v3535_v53 }
 0x26c   : > { %v1074_v7 = vsel %vm553_vm3, %v2975_v38, %v1054_v2  ;;  %v1084_v17 = vsel %vm553_vm3, %v1054_v2, %v1064_v28  ;;  %v2246_v38 = vpack.c.bf16 %v1091_v58, %v1087_v39  ;;  %v3537_v58 = vld [vmem:[#allocation9_spill] sm:$0xff] }
 0x26d   : > { %v1089_v52 = vmul.f32 %v1084_v17, %v2636_v21  ;;  %v1092_v63 = vmul.f32 %v1074_v7, %v2639_v23  ;;  %2209 = vmatprep.subr.bf16.mxu0 %v2208_v61  ;;  %v1110_v21 = vsel %vm590_vm4, %v2973_v43, %v2892_v41  ;;  %v2214_v43 = vpack.c.bf16 %v2803_v29, %v2753_v26  ;;  %v3531_v29 = vld [vmem:[#allocation24_spill] sm:$0xff]  ;;  %v3538_v17 = vld [vmem:[#allocation14_spill] sm:$0xff] }
 0x26e   : > { %v3077_v8 = vpop.permute.xlu1 %1219  ;;  %v1128_v62 = vmul.f32 %v1110_v21, %v3527_v3  ;;  %v1212_v7 = vmul.f32 %v1194_v49, %v3537_v58  ;;  %v3539_v21 = vld [vmem:[#allocation16_spill] sm:$0xff] }
 0x26f   : > { %v2210_v56 = vpack.c.bf16 %v1089_v52, %v1085_v50  ;;  %v3079_v19 = vpop.permute.xlu0 %1189  ;;  %v2244_v25 = vpack.c.bf16 %v1092_v63, %v1088_v45  ;;  %v1211_v50 = vmul.f32 %v1193_v15, %v3538_v17  ;;  %v1235_v39 = vsel %vm704_vm7, %v3077_v8, %v3063_v54 }
 0x271   : > { %2211 = vmatpush1.bf16.msra.mxu0 %v2210_v56  ;;  %2245 = vmatprep.subr.bf16.mxu1 %v2244_v25 }
 0x272   : > { %2213 = vmatprep.subr.bf16.mxu0 %v2212_v22  ;;  %2247 = vmatpush1.bf16.msra.mxu1 %v2246_v38  ;;  %v1104_v23 = vpop.permute.xlu1 %1103 }
 0x273   : > { %v1112_v32 = vsel %vm590_vm4, %v2961_v24, %v1104_v23  ;;  %v1113_v0 = vsel %vm590_vm4, %v1104_v23, %v2959_v9  ;;  %v3095_v1 = vpop.permute.xlu0 %1185  ;;  %2249 = vmatprep.subr.bf16.mxu1 %v2248_v20 }
 0x274   : > { %v1131_v33 = vmul.f32 %v1112_v32, %v3526_v37  ;;  %v1132_v28 = vmul.f32 %v1113_v0, %v3527_v3  ;;  %v3540_v0 = vld [vmem:[#allocation18_spill] sm:$0xff] }
 0x275   : > { %2215 = vmatpush1.bf16.msra.mxu0 %v2214_v43  ;;  %v1253_v43 = vmul.f32 %v3540_v0, %v1235_v39 }
 0x276   : > { %v2218_v26 = vpack.c.bf16 %v1131_v33, %v1127_v10  ;;  %2251 = vmatpush1.bf16.msra.mxu1 %v2250_v35  ;;  %v1146_v59 = vpop.permute.xlu1 %1145  ;;  %v2216_v11 = vpack.c.bf16 %v1132_v28, %v1128_v62  ;;  %v3541_v28 = vld [vmem:[#allocation5_spill] sm:$0xff] }
 0x277   : > { %v1154_v31 = vsel %vm628_vm5, %v3531_v29, %v1146_v59  ;;  %v1155_v44 = vsel %vm628_vm5, %v1146_v59, %v3532_v27  ;;  %v3115_v14 = vpop.permute.xlu0 %1223 }
 0x278   : > { %v1173_v16 = vmul.f32 %v1154_v31, %v3533_v48  ;;  %v1174_v42 = vmul.f32 %v1155_v44, %v3534_v55  ;;  %2217 = vmatprep.subr.bf16.mxu0 %v2216_v11  ;;  %v1236_v63 = vsel %vm704_vm7, %v3063_v54, %v3115_v14  ;;  %v3173_v44 = vld [vmem:[%s3452_s4 + $0x18] sm:$0xff] }
 0x279   : > { %2219 = vmatpush1.bf16.msra.mxu0 %v2218_v26  ;;  %v1254_v20 = vmul.f32 %v3539_v21, %v1236_v63 }
 0x27a   : > { %v2222_v18 = vpack.c.bf16 %v1173_v16, %v1169_v12  ;;  %v1188_v6 = vpop.permute.xlu1 %1187  ;;  %v2220_v13 = vpack.c.bf16 %v1174_v42, %v1170_v4  ;;  %v3543_v4 = vld [vmem:[#allocation10_spill] sm:$0xff]  ;;  %v3544_v42 = vld [vmem:[#allocation12_spill] sm:$0xff] }
 0x27b   : > { %v1196_v60 = vsel %vm666_vm6, %v3095_v1, %v1188_v6  ;;  %v1197_v2 = vsel %vm666_vm6, %v1188_v6, %v3079_v19  ;;  %v3131_v61 = vpop.permute.xlu0 %1231 }
 0x27c   : > { %v1215_v45 = vmul.f32 %v1196_v60, %v3538_v17  ;;  %v1216_v52 = vmul.f32 %v1197_v2, %v3537_v58  ;;  %2221 = vmatprep.subr.bf16.mxu0 %v2220_v13 }
 0x27d   : > { %2223 = vmatpush1.bf16.msra.mxu0 %v2222_v18 }
 0x27e   : > { %v2226_v56 = vpack.c.bf16 %v1215_v45, %v1211_v50  ;;  %v1230_v25 = vpop.permute.xlu1 %1229  ;;  %v2224_v38 = vpack.c.bf16 %v1216_v52, %v1212_v7  ;;  %v3545_v7 = vld [vmem:[#allocation13_spill] sm:$0xff]  ;;  %v3546_v50 = vld [vmem:[#allocation15_spill] sm:$0xff] }
 0x27f   : > { %v1239_v22 = vsel %vm704_vm7, %v1230_v25, %v3131_v61  ;;  %v3145_v5 = vpop.permute.xlu0 %1227 }
 0x280   : > { %v1258_v23 = vmul.f32 %v3539_v21, %v1239_v22  ;;  %v1238_v32 = vsel %vm704_vm7, %v3145_v5, %v1230_v25  ;;  %2225 = vmatprep.subr.bf16.mxu0 %v2224_v38 }
 0x281   : > { %v1257_v54 = vmul.f32 %v3540_v0, %v1238_v32  ;;  %2227 = vmatpush1.bf16.msra.mxu0 %v2226_v56  ;;  %v3548_v32 = vld [vmem:[#allocation19_spill] sm:$0xff] }
 0x282   : > { %v1100_v35 = vpop.permute.xlu1 %1099  ;;  %v2228_v37 = vpack.c.bf16 %v1258_v23, %v1254_v20  ;;  %v3547_v20 = vld [vmem:[#allocation17_spill] sm:$0xff] }
 0x283   : > { %v2230_v10 = vpack.c.bf16 %v1257_v54, %v1253_v43  ;;  %v1111_v3 = vsel %vm590_vm4, %v2892_v41, %v1100_v35  ;;  %v1125_v62 = vsel %vm590_vm4, %v1100_v35, %v2943_v34  ;;  %v1108_v33 = vpop.permute.xlu0 %1107  ;;  %v3168_v41 = vld [vmem:[%s3452_s4] sm:$0xff] }
 0x284   : > { %v1129_v36 = vmul.f32 %v1111_v3, %v3541_v28  ;;  %v1130_v40 = vmul.f32 %v1125_v62, %v3542_v51  ;;  %v1114_v26 = vsel %vm590_vm4, %v2959_v9, %v1108_v33  ;;  %v1126_v59 = vsel %vm590_vm4, %v1108_v33, %v2961_v24  ;;  %2229 = vmatprep.subr.bf16.mxu0 %v2228_v37  ;;  %v1272_v3 = vld [vmem:[%s3452_s4 + $0x58] sm:$0xff]  ;;  %v1271_v62 = vld [vmem:[%s3452_s4 + $0x50] sm:$0xff]  ;;  %v1274_v33 = vld [vmem:[%s3452_s4 + $0x68] sm:$0xff] }
 0x285   : > { %v1133_v11 = vmul.f32 %v1114_v26, %v3541_v28  ;;  %v1134_v31 = vmul.f32 %v1126_v59, %v3542_v51  ;;  %2231 = vmatpush1.bf16.msra.mxu0 %v2230_v10  ;;  %v1273_v28 = vld [vmem:[%s3452_s4 + $0x60] sm:$0xff]  ;;  %v1275_v51 = vld [vmem:[%s3452_s4 + $0x70] sm:$0xff] }
 0x286   : > { %v1142_v34 = vpop.permute.xlu1 %1141 }
 0x287   : > { %v2254_v9 = vpack.c.bf16 %v1133_v11, %v1129_v36  ;;  %v1153_v24 = vsel %vm628_vm5, %v3530_v57, %v1142_v34  ;;  %v1167_v48 = vsel %vm628_vm5, %v1142_v34, %v3529_v47  ;;  %v1150_v12 = vpop.permute.xlu0 %1149  ;;  %v2252_v55 = vpack.c.bf16 %v1134_v31, %v1130_v40  ;;  %v1263_v47 = vld [vmem:[%s3452_s4 + $0x10] sm:$0xff]  ;;  %v1276_v36 = vld [vmem:[%s3452_s4 + $0x78] sm:$0xff] }
 0x288   : > { %v1171_v16 = vmul.f32 %v1153_v24, %v3543_v4  ;;  %v1172_v46 = vmul.f32 %v1167_v48, %v3544_v42  ;;  %v1156_v49 = vsel %vm628_vm5, %v3532_v27, %v1150_v12  ;;  %v1168_v15 = vsel %vm628_vm5, %v1150_v12, %v3531_v29  ;;  %1415 = vmatmul.mubr.f32.vlgmr.msra.gmra.mrb[4].mxu0 %v3168_v41  ;;  %v1266_v29 = vld [vmem:[%s3452_s4 + $0x28] sm:$0xff] }
 0x289   : > { %v1175_v18 = vmul.f32 %v1156_v49, %v3543_v4  ;;  %v1176_v57 = vmul.f32 %v1168_v15, %v3544_v42  ;;  %2253 = vmatprep.subr.bf16.mxu1 %v2252_v55  ;;  %2106 = vmatprep.mubr.msk.f32.mxu0 %vm1325_vm9, %v3173_v44  ;;  %v3549_v40 = vmov 0.0  }
 0x28a   : > { %2255 = vmatpush1.bf16.msra.mxu1 %v2254_v9  ;;  %v1184_v6 = vpop.permute.xlu1 %1183 }
 0x28b   : > { %v2258_v27 = vpack.c.bf16 %v1175_v18, %v1171_v16  ;;  %v1195_v13 = vsel %vm666_vm6, %v3535_v53, %v1184_v6  ;;  %v1209_v60 = vsel %vm666_vm6, %v1184_v6, %v3050_v30  ;;  %v1192_v2 = vpop.permute.xlu0 %1191  ;;  %v2256_v58 = vpack.c.bf16 %v1176_v57, %v1172_v46  ;;  %v1265_v30 = vld [vmem:[%s3452_s4 + $0x20] sm:$0xff] }
 0x28c   : > { %v1213_v17 = vmul.f32 %v1195_v13, %v3545_v7  ;;  %v1214_v45 = vmul.f32 %v1209_v60, %v3546_v50  ;;  %v1198_v52 = vsel %vm666_vm6, %v3079_v19, %v1192_v2  ;;  %v1210_v63 = vsel %vm666_vm6, %v1192_v2, %v3095_v1  ;;  %1421 = vmatmul.mubr.f32.gmra.mrb[6].mxu0 %v1263_v47  ;;  %v1268_v19 = vld [vmem:[%s3452_s4 + $0x38] sm:$0xff] }
 0x28d   : > { %v1217_v39 = vmul.f32 %v1198_v52, %v3545_v7  ;;  %v1218_v53 = vmul.f32 %v1210_v63, %v3546_v50  ;;  %2257 = vmatprep.subr.bf16.mxu1 %v2256_v58  ;;  %2107 = vmatprep.mubr.msk.f32.mxu0 %vm1325_vm9, %v1266_v29 }
 0x28e   : > { %2259 = vmatpush1.bf16.msra.mxu1 %v2258_v27  ;;  %v1226_v56 = vpop.permute.xlu1 %1225 }
 0x28f   : > { %v2262_v25 = vpack.c.bf16 %v1217_v39, %v1213_v17  ;;  %v1237_v1 = vsel %vm704_vm7, %v3115_v14, %v1226_v56  ;;  %v1251_v38 = vsel %vm704_vm7, %v1226_v56, %v3077_v8  ;;  %v1234_v22 = vpop.permute.xlu0 %1233  ;;  %v2260_v21 = vpack.c.bf16 %v1218_v53, %v1214_v45  ;;  %v1267_v8 = vld [vmem:[%s3452_s4 + $0x30] sm:$0xff] }
 0x290   : > { %v1255_v23 = vmul.f32 %v3547_v20, %v1237_v1  ;;  %v1256_v0 = vmul.f32 %v3548_v32, %v1251_v38  ;;  %v1240_v43 = vsel %vm704_vm7, %v3131_v61, %v1234_v22  ;;  %v1252_v54 = vsel %vm704_vm7, %v1234_v22, %v3145_v5  ;;  %1427 = vmatmul.mubr.f32.gmra.mrb[8].mxu0 %v1265_v30  ;;  %v1270_v61 = vld [vmem:[%s3452_s4 + $0x48] sm:$0xff]  ;;  %v1269_v5 = vld [vmem:[%s3452_s4 + $0x40] sm:$0xff] }
 0x291   : > { %v1259_v35 = vmul.f32 %v3547_v20, %v1240_v43  ;;  %v1260_v14 = vmul.f32 %v3548_v32, %v1252_v54  ;;  %2261 = vmatprep.subr.bf16.mxu1 %v2260_v21  ;;  %2108 = vmatprep.mubr.msk.f32.mxu0 %vm1325_vm9, %v1268_v19 }
 0x292   : > { %2263 = vmatpush1.bf16.msra.mxu1 %v2262_v25 }
 0x293   : > { %v2266_v37 = vpack.c.bf16 %v1259_v35, %v1255_v23  ;;  %v2264_v10 = vpack.c.bf16 %v1260_v14, %v1256_v0 }
 0x294   : > { %1433 = vmatmul.mubr.f32.gmra.mrb[10].mxu0 %v1267_v8 }
 0x295   : > { %2265 = vmatprep.subr.bf16.mxu1 %v2264_v10  ;;  %2109 = vmatprep.mubr.msk.f32.mxu0 %vm1325_vm9, %v1270_v61 }
 0x296   : > { %2267 = vmatpush1.bf16.msra.mxu1 %v2266_v37 }
 0x298   : > { %1439 = vmatmul.mubr.f32.gmra.mrb[12].mxu0 %v1269_v5 }
 0x299   : > { %1528 = vmatmul.mubr.f32.vlgmr.msra.gmra.mrb[4].mxu1 %v3168_v41  ;;  %2110 = vmatprep.mubr.msk.f32.mxu0 %vm1325_vm9, %v1272_v3 }
 0x29a   : > { %2114 = vmatprep.mubr.msk.f32.mxu1 %vm1325_vm9, %v3173_v44 }
 0x29c   : > { %1445 = vmatmul.mubr.f32.gmra.mrb[14].mxu0 %v1271_v62 }
 0x29d   : > { %1534 = vmatmul.mubr.f32.gmra.mrb[6].mxu1 %v1263_v47  ;;  %2111 = vmatprep.mubr.msk.f32.mxu0 %vm1325_vm9, %v1274_v33 }
 0x29e   : > { %2115 = vmatprep.mubr.msk.f32.mxu1 %vm1325_vm9, %v1266_v29 }
 0x29f   : > { %v1288_v11 = vpop.permute.xlu1 %1287 }
 0x2a0   : > { %1451 = vmatmul.mubr.f32.gmra.mrb[16].mxu0 %v1273_v28  ;;  %v1293_v41 = vpop.permute.xlu0 %1292 }
 0x2a1   : > { %1540 = vmatmul.mubr.f32.gmra.mrb[8].mxu1 %v1265_v30  ;;  %2112 = vmatprep.mubr.msk.f32.mxu0 %vm1325_vm9, %v1276_v36 }
 0x2a2   : > { %2116 = vmatprep.mubr.msk.f32.mxu1 %vm1325_vm9, %v1268_v19 }
 0x2a3   : > { %v1298_v15 = vpop.permute.xlu1 %1297 }
 0x2a4   : > { %1457 = vmatmul.mubr.f32.gmra.mrb[18].mxu0 %v1275_v51  ;;  %v3269_v47 = vpop.permute.xlu0 %1302 }
 0x2a5   : > { %1546 = vmatmul.mubr.f32.gmra.mrb[10].mxu1 %v1267_v8 }
 0x2a6   : > { %2117 = vmatprep.mubr.msk.f32.mxu1 %vm1325_vm9, %v1270_v61 }
 0x2a7   : > { %v3273_v39 = vpop.permute.xlu1 %1307 }
 0x2a8   : > { %v3276_v19 = vpop.permute.xlu0 %1312 }
 0x2a9   : > { %1552 = vmatmul.mubr.f32.gmra.mrb[12].mxu1 %v1269_v5 }
 0x2aa   : > { %2118 = vmatprep.mubr.msk.f32.mxu1 %vm1325_vm9, %v1272_v3 }
 0x2ad   : > { %1558 = vmatmul.mubr.f32.gmra.mrb[14].mxu1 %v1271_v62 }
 0x2ae   : > { %2119 = vmatprep.mubr.msk.f32.mxu1 %vm1325_vm9, %v1274_v33 }
 0x2b1   : > { %1564 = vmatmul.mubr.f32.gmra.mrb[16].mxu1 %v1273_v28 }
 0x2b2   : > { %2120 = vmatprep.mubr.msk.f32.mxu1 %vm1325_vm9, %v1276_v36 }
 0x2b5   : > { %1570 = vmatmul.mubr.f32.gmra.mrb[18].mxu1 %v1275_v51  ;;  %v1318_v51 = vpop.permute.xlu1 %1317 }
 0x2b6   : > { %1683 = vmatprep.mubr.f32.mxu1 %v3549_v40 }
 0x35b   : > { %v1416_v26 = vpop.f32.mrb[4].mxu0 }
 0x35c   : > { %v1418_v59 = vpop.f32.mrb[5].mxu0  ;;  %v1417_v31 = vadd.f32 %v1416_v26, %v1288_v11 }
 0x35d   : > { %v1419_v34 = vadd.f32 %v1418_v59, %v1288_v11 }
 0x35e   : > { %v1576_v12 = vmax.f32 %v1417_v31, 0.0 }
 0x35f   : > { %v1422_v44 = vpop.f32.mrb[6].mxu0  ;;  %v1577_v4 = vmax.f32 %v1419_v34, 0.0 }
 0x360   : > { %v1423_v9 = vadd.f32 %v1422_v44, %v1293_v41  ;;  %v1424_v24 = vpop.f32.mrb[7].mxu0  ;;  %v1323_v44 = vpop.permute.xlu0 %1322 }
 0x361   : > { %v1425_v48 = vadd.f32 %v1424_v24, %v1293_v41 }
 0x362   : > { %v1580_v55 = vmax.f32 %v1423_v9, 0.0 }
 0x363   : > { %v1581_v16 = vmax.f32 %v1425_v48, 0.0  ;;  %v1428_v42 = vpop.f32.mrb[8].mxu0 }
 0x364   : > { %v2270_v46 = vpack.c.bf16 %v1580_v55, %v1576_v12  ;;  %v1430_v49 = vpop.f32.mrb[9].mxu0  ;;  %v1429_v57 = vadd.f32 %v1428_v42, %v1298_v15 }
 0x365   : > { %v2268_v18 = vpack.c.bf16 %v1581_v16, %v1577_v4  ;;  %v1431_v6 = vadd.f32 %v1430_v49, %v1298_v15 }
 0x366   : > { %v1584_v2 = vmax.f32 %v1429_v57, 0.0 }
 0x367   : > { %v1434_v29 = vpop.f32.mrb[10].mxu0  ;;  %2269 = vmatprep.subr.bf16.mxu1 %v2268_v18  ;;  %v1585_v7 = vmax.f32 %v1431_v6, 0.0 }
 0x368   : > { %v1435_v27 = vadd.f32 %v1434_v29, %v3269_v47  ;;  %v1436_v13 = vpop.f32.mrb[11].mxu0  ;;  %2271 = vmatpush1.bf16.msra.mxu1 %v2270_v46 }
 0x369   : > { %v1437_v60 = vadd.f32 %v1436_v13, %v3269_v47 }
 0x36a   : > { %v1588_v58 = vmax.f32 %v1435_v27, 0.0 }
 0x36b   : > { %v1589_v17 = vmax.f32 %v1437_v60, 0.0  ;;  %v1440_v50 = vpop.f32.mrb[12].mxu0 }
 0x36c   : > { %v2274_v45 = vpack.c.bf16 %v1588_v58, %v1584_v2  ;;  %v1442_v52 = vpop.f32.mrb[13].mxu0  ;;  %v1529_v63 = vpop.f32.mrb[4].mxu1  ;;  %v1441_v56 = vadd.f32 %v1440_v50, %v3273_v39 }
 0x36d   : > { %v2272_v53 = vpack.c.bf16 %v1589_v17, %v1585_v7  ;;  %v1531_v30 = vpop.f32.mrb[5].mxu1  ;;  %v1443_v25 = vadd.f32 %v1442_v52, %v3273_v39  ;;  %v1530_v1 = vadd.f32 %v1529_v63, %v1288_v11 }
 0x36e   : > { %v1532_v22 = vadd.f32 %v1531_v30, %v1288_v11  ;;  %v1592_v54 = vmax.f32 %v1441_v56, 0.0 }
 0x36f   : > { %v1446_v38 = vpop.f32.mrb[14].mxu0  ;;  %2273 = vmatprep.subr.bf16.mxu1 %v2272_v53  ;;  %v1593_v8 = vmax.f32 %v1443_v25, 0.0  ;;  %v1578_v61 = vmax.f32 %v1530_v1, 0.0 }
 0x370   : > { %v1447_v21 = vadd.f32 %v1446_v38, %v3276_v19  ;;  %v1448_v20 = vpop.f32.mrb[15].mxu0  ;;  %v1535_v23 = vpop.f32.mrb[6].mxu1  ;;  %2275 = vmatpush1.bf16.msra.mxu1 %v2274_v45  ;;  %v1579_v3 = vmax.f32 %v1532_v22, 0.0 }
 0x371   : > { %v1449_v32 = vadd.f32 %v1448_v20, %v3276_v19  ;;  %v1536_v0 = vadd.f32 %v1535_v23, %v1293_v41  ;;  %v1537_v43 = vpop.f32.mrb[7].mxu1 }
 0x372   : > { %v1596_v35 = vmax.f32 %v1447_v21, 0.0  ;;  %v1538_v14 = vadd.f32 %v1537_v43, %v1293_v41 }
 0x373   : > { %v1597_v37 = vmax.f32 %v1449_v32, 0.0  ;;  %v1582_v10 = vmax.f32 %v1536_v0, 0.0  ;;  %v1452_v5 = vpop.f32.mrb[16].mxu0 }
 0x374   : > { %v2278_v62 = vpack.c.bf16 %v1596_v35, %v1592_v54  ;;  %v1583_v33 = vmax.f32 %v1538_v14, 0.0  ;;  %v1454_v28 = vpop.f32.mrb[17].mxu0  ;;  %v1541_v36 = vpop.f32.mrb[8].mxu1  ;;  %v1453_v34 = vadd.f32 %v1452_v5, %v1318_v51 }
 0x375   : > { %v2276_v26 = vpack.c.bf16 %v1597_v37, %v1593_v8  ;;  %v2286_v59 = vpack.c.bf16 %v1582_v10, %v1578_v61  ;;  %v1543_v11 = vpop.f32.mrb[9].mxu1  ;;  %v1455_v9 = vadd.f32 %v1454_v28, %v1318_v51  ;;  %v1542_v24 = vadd.f32 %v1541_v36, %v1298_v15 }
 0x376   : > { %v2284_v31 = vpack.c.bf16 %v1583_v33, %v1579_v3  ;;  %v1544_v48 = vadd.f32 %v1543_v11, %v1298_v15  ;;  %v1600_v49 = vmax.f32 %v1453_v34, 0.0 }
 0x377   : > { %v1458_v41 = vpop.f32.mrb[18].mxu0  ;;  %2277 = vmatprep.subr.bf16.mxu1 %v2276_v26  ;;  %v1601_v6 = vmax.f32 %v1455_v9, 0.0  ;;  %v1586_v29 = vmax.f32 %v1542_v24, 0.0  ;;  %v1902_v24 = vld [vmem:[%s3456_s8 + $0x80] sm:$0xff] }
 0x378   : > { %v1459_v12 = vadd.f32 %v1458_v41, %v1323_v44  ;;  %v1460_v55 = vpop.f32.mrb[19].mxu0  ;;  %v1547_v4 = vpop.f32.mrb[10].mxu1  ;;  %2279 = vmatpush1.bf16.msra.mxu1 %v2278_v62  ;;  %v1587_v60 = vmax.f32 %v1544_v48, 0.0  ;;  %v1903_v41 = vld [vmem:[%s3456_s8 + $0x88] sm:$0xff]  ;;  %v1886_v48 = vld [vmem:[%s3456_s8] sm:$0xff] }
 0x379   : > { %v1461_v16 = vadd.f32 %v1460_v55, %v1323_v44  ;;  %v1548_v42 = vadd.f32 %v1547_v4, %v3269_v47  ;;  %v1549_v46 = vpop.f32.mrb[11].mxu1  ;;  %v1887_v55 = vld [vmem:[%s3456_s8 + $0x8] sm:$0xff]  ;;  %v1904_v4 = vld [vmem:[%s3456_s8 + $0x90] sm:$0xff] }
 0x37a   : > { %v1604_v18 = vmax.f32 %v1459_v12, 0.0  ;;  %v1550_v57 = vadd.f32 %v1549_v46, %v3269_v47  ;;  %v1608_v47 = vld [vmem:[%s3454_s6] sm:$0xf]  ;;  %v2300_v12 = vpack.c.bf16 %v1903_v41, %v1902_v24 }
 0x37b   : > { %v1605_v27 = vmax.f32 %v1461_v16, 0.0  ;;  %v1590_v13 = vmax.f32 %v1548_v42, 0.0  ;;  %v1905_v16 = vld [vmem:[%s3456_s8 + $0x98] sm:$0xff]  ;;  %v2302_v42 = vpack.c.bf16 %v1887_v55, %v1886_v48 }
 0x37c   : > { %v2282_v2 = vpack.c.bf16 %v1604_v18, %v1600_v49  ;;  %v1591_v58 = vmax.f32 %v1550_v57, 0.0  ;;  %v1553_v15 = vpop.f32.mrb[12].mxu1  ;;  %v2304_v46 = vpack.c.bf16 %v1905_v16, %v1904_v4  ;;  %v1888_v49 = vld [vmem:[%s3456_s8 + $0x10] sm:$0xff]  ;;  %v1889_v18 = vld [vmem:[%s3456_s8 + $0x18] sm:$0xff]  ;;  %v1906_v57 = vld [vmem:[%s3456_s8 + $0xa0] sm:$0xff]  ;;  %2301 = vmatprep.subr.bf16.mxu0 %v2300_v12 }
 0x37d   : > { %v2280_v7 = vpack.c.bf16 %v1605_v27, %v1601_v6  ;;  %v2290_v17 = vpack.c.bf16 %v1590_v13, %v1586_v29  ;;  %v1555_v50 = vpop.f32.mrb[13].mxu1  ;;  %v1554_v52 = vadd.f32 %v1553_v15, %v3273_v39  ;;  %v1907_v6 = vld [vmem:[%s3456_s8 + $0xa8] sm:$0xff]  ;;  %2303 = vmatpush3.bf16.msra.mxu0 %v2302_v42  ;;  %v2306_v29 = vpack.c.bf16 %v1889_v18, %v1888_v49  ;;  %v1890_v13 = vld [vmem:[%s3456_s8 + $0x20] sm:$0xff]  ;;  %v1916_v49 = vld [vmem:[%s3456_s8 + $0xf0] sm:$0xff] }
 0x37e   : > { %v2288_v45 = vpack.c.bf16 %v1591_v58, %v1587_v60  ;;  %v1556_v63 = vadd.f32 %v1555_v50, %v3273_v39  ;;  %2305 = vmatprep.subr.bf16.mxu0 %v2304_v46  ;;  %v2308_v27 = vpack.c.bf16 %v1907_v6, %v1906_v57  ;;  %v1891_v60 = vld [vmem:[%s3456_s8 + $0x28] sm:$0xff]  ;;  %v1909_v58 = vld [vmem:[%s3456_s8 + $0xb8] sm:$0xff] }
 0x37f   : > { %2281 = vmatprep.subr.bf16.mxu1 %v2280_v7  ;;  %v1594_v1 = vmax.f32 %v1554_v52, 0.0  ;;  %v2310_v15 = vpack.c.bf16 %v1891_v60, %v1890_v13  ;;  %v1893_v50 = vld [vmem:[%s3456_s8 + $0x38] sm:$0xff]  ;;  %v1911_v52 = vld [vmem:[%s3456_s8 + $0xc8] sm:$0xff] }
 0x380   : > { %v1559_v53 = vpop.f32.mrb[14].mxu1  ;;  %2283 = vmatpush1.bf16.msra.mxu1 %v2282_v2  ;;  %v1595_v22 = vmax.f32 %v1556_v63, 0.0  ;;  %v1908_v2 = vld [vmem:[%s3456_s8 + $0xb0] sm:$0xff]  ;;  %v1917_v18 = vld [vmem:[%s3456_s8 + $0xf8] sm:$0xff] }
 0x381   : > { %v1560_v30 = vadd.f32 %v1559_v53, %v3276_v19  ;;  %v1561_v56 = vpop.f32.mrb[15].mxu1  ;;  %2285 = vmatprep.subr.bf16.mxu1 %v2284_v31  ;;  %2307 = vmatpush3.bf16.msra.mxu0 %v2306_v29  ;;  %v2312_v7 = vpack.c.bf16 %v1909_v58, %v1908_v2  ;;  %v2328_v29 = vpack.c.bf16 %v1917_v18, %v1916_v49  ;;  %v1901_v13 = vld [vmem:[%s3456_s8 + $0x78] sm:$0xff] }
 0x382   : > { %v1562_v25 = vadd.f32 %v1561_v56, %v3276_v19  ;;  %2309 = vmatprep.subr.bf16.mxu0 %v2308_v27  ;;  %v1912_v56 = vld [vmem:[%s3456_s8 + $0xd0] sm:$0xff] }
 0x383   : > { %v1598_v38 = vmax.f32 %v1560_v30, 0.0  ;;  %2121 = vmatmul.mubr.msk.f32.vlgmr.msra.gmra.mrb[20].mxu1 %vm1615_vm10, %v1608_v47  ;;  %v1895_v30 = vld [vmem:[%s3456_s8 + $0x48] sm:$0xff]  ;;  %v1900_v27 = vld [vmem:[%s3456_s8 + $0x70] sm:$0xff] }
 0x384   : > { %v1599_v21 = vmax.f32 %v1562_v25, 0.0  ;;  %v1565_v39 = vpop.f32.mrb[16].mxu1  ;;  %2287 = vmatpush1.bf16.msra.mxu1 %v2286_v59  ;;  %1754 = vmatprep.mubr.f32.mxu1 %v3549_v40  ;;  %v1613_v40 = vpop.permute.xlu1 %1612  ;;  %v1913_v25 = vld [vmem:[%s3456_s8 + $0xd8] sm:$0xff]  ;;  %v2330_v58 = vpack.c.bf16 %v1901_v13, %v1900_v27 }
 0x385   : > { %v2294_v20 = vpack.c.bf16 %v1598_v38, %v1594_v1  ;;  %v1567_v23 = vpop.f32.mrb[17].mxu1  ;;  %2289 = vmatprep.subr.bf16.mxu1 %v2288_v45  ;;  %v1566_v0 = vadd.f32 %v1565_v39, %v1318_v51  ;;  %v1910_v45 = vld [vmem:[%s3456_s8 + $0xc0] sm:$0xff]  ;;  %2311 = vmatpush3.bf16.msra.mxu0 %v2310_v15  ;;  %v2320_v38 = vpack.c.bf16 %v1913_v25, %v1912_v56 }
 0x386   : > { %v2292_v32 = vpack.c.bf16 %v1599_v21, %v1595_v22  ;;  %v1568_v43 = vadd.f32 %v1567_v23, %v1318_v51  ;;  %2313 = vmatprep.subr.bf16.mxu0 %v2312_v7  ;;  %v2316_v53 = vpack.c.bf16 %v1911_v52, %v1910_v45  ;;  %v1896_v22 = vld [vmem:[%s3456_s8 + $0x50] sm:$0xff]  ;;  %v1897_v21 = vld [vmem:[%s3456_s8 + $0x58] sm:$0xff]  ;;  %v1914_v39 = vld [vmem:[%s3456_s8 + $0xe0] sm:$0xff] }
 0x387   : > { %v1602_v8 = vmax.f32 %v1566_v0, 0.0  ;;  %v2322_v23 = vpack.c.bf16 %v1897_v21, %v1896_v22  ;;  %v1898_v0 = vld [vmem:[%s3456_s8 + $0x60] sm:$0xff] }
 0x388   : > { %v1571_v54 = vpop.f32.mrb[18].mxu1  ;;  %2291 = vmatpush1.bf16.msra.mxu1 %v2290_v17  ;;  %v1603_v37 = vmax.f32 %v1568_v43, 0.0  ;;  %v1892_v17 = vld [vmem:[%s3456_s8 + $0x30] sm:$0xff]  ;;  %v1899_v43 = vld [vmem:[%s3456_s8 + $0x68] sm:$0xff] }
 0x389   : > { %v1572_v35 = vadd.f32 %v1571_v54, %v1323_v44  ;;  %v1573_v19 = vpop.f32.mrb[19].mxu1  ;;  %2293 = vmatprep.subr.bf16.mxu1 %v2292_v32  ;;  %v2314_v63 = vpack.c.bf16 %v1893_v50, %v1892_v17  ;;  %v2326_v54 = vpack.c.bf16 %v1899_v43, %v1898_v0 }
 0x38a   : > { %v1574_v14 = vadd.f32 %v1573_v19, %v1323_v44 }
 0x38b   : > { %v1606_v61 = vmax.f32 %v1572_v35, 0.0  ;;  %2315 = vmatpush3.bf16.msra.mxu0 %v2314_v63 }
 0x38c   : > { %v1607_v10 = vmax.f32 %v1574_v14, 0.0  ;;  %2295 = vmatpush1.bf16.msra.mxu1 %v2294_v20  ;;  %2317 = vmatprep.subr.bf16.mxu0 %v2316_v53  ;;  %v1915_v20 = vld [vmem:[%s3456_s8 + $0xe8] sm:$0xff] }
 0x38d   : > { %v2298_v5 = vpack.c.bf16 %v1606_v61, %v1602_v8  ;;  %v2324_v32 = vpack.c.bf16 %v1915_v20, %v1914_v39 }
 0x38e   : > { %v2296_v3 = vpack.c.bf16 %v1607_v10, %v1603_v37 }
 0x390   : > { %2297 = vmatprep.subr.bf16.mxu1 %v2296_v3 }
 0x391   : > { %2299 = vmatpush1.bf16.msra.mxu1 %v2298_v5 }
 0x394   : > { %2122 = vmatmul.mubr.msk.f32.vlgmr.msra.gmra.mrb[22].mxu1 %vm1615_vm10, %v1608_v47  ;;  %v1894_v47 = vld [vmem:[%s3456_s8 + $0x40] sm:$0xff] }
 0x395   : > { %v2318_v1 = vpack.c.bf16 %v1895_v30, %v1894_v47 }
 0x397   : > { %2319 = vmatpush3.bf16.msra.mxu0 %v2318_v1 }
 0x398   : > { %2321 = vmatprep.subr.bf16.mxu0 %v2320_v38 }
 0x39b   : > { %2323 = vmatpush3.bf16.msra.mxu0 %v2322_v23 }
 0x39c   : > { %2325 = vmatprep.subr.bf16.mxu0 %v2324_v32 }
 0x39f   : > { %2327 = vmatpush3.bf16.msra.mxu0 %v2326_v54 }
 0x3a0   : > { %2329 = vmatprep.subr.bf16.mxu0 %v2328_v29 }
 0x3a3   : > { %2331 = vmatpush3.bf16.msra.mxu0 %v2330_v58 }
 0x456   : > { %v1685_v62 = vpop.f32.mrb[20].mxu1 }
 0x457   : > { %v1686_v33 = vadd.f32 %v1685_v62, %v1613_v40  ;;  %v1687_v28 = vpop.f32.mrb[21].mxu1 }
 0x458   : > { %v1688_v36 = vadd.f32 %v1687_v28, %v1613_v40 }
 0x459   : > { %v1761_v51 = vmax.f32 %v1686_v33, 0.0 }
 0x45a   : > { %v1762_v26 = vmax.f32 %v1688_v36, 0.0 }
 0x45b   : > { %1766 = vst.msk [vmem:[#allocation2] sm:$0xf] %vm1765_vm11, %v1761_v51  ;;  %1768 = vrot.lane.b32.xlu0 %v1761_v51, %s2380_s29 }
 0x45c   : > { %1774 = vst.msk [vmem:[#allocation2 + $0x8] sm:$0xf] %vm1765_vm11, %v1762_v26  ;;  %1776 = vrot.lane.b32.xlu1 %v1762_v26, %s2380_s29 }
 0x462   : > { %v1797_v14 = vld [vmem:[#allocation2] sm:$0xf] }
 0x463   : > { %v1799_v8 = vld [vmem:[#allocation2 + $0x8] sm:$0xf]  ;;  %v1852_v5 = vrot.slane %v1797_v14, 2  ;;  %v1835_v24 = vrot.slane %v1797_v14, 1  ;;  %v1867_v41 = vrot.slane %v1797_v14, 3 }
 0x464   : > { %v1816_v33 = vrot.slane %v1799_v8, 6  ;;  %v1837_v42 = vrot.slane %v1799_v8, 7  ;;  %v1870_v46 = vrot.slane %v1799_v8, 1 }
 0x467   : > { %v1756_v59 = vpop.f32.mrb[22].mxu1 }
 0x468   : > { %v1757_v11 = vadd.f32 %v1756_v59, %v1613_v40  ;;  %v1758_v31 = vpop.f32.mrb[23].mxu1 }
 0x469   : > { %v1759_v34 = vadd.f32 %v1758_v31, %v1613_v40 }
 0x46a   : > { %v1763_v44 = vmax.f32 %v1757_v11, 0.0 }
 0x46b   : > { %v1764_v9 = vmax.f32 %v1759_v34, 0.0 }
 0x46c   : > { %1782 = vst.msk [vmem:[#allocation2 + $0x10] sm:$0xf] %vm1765_vm11, %v1763_v44  ;;  %1784 = vrot.lane.b32.xlu0 %v1763_v44, %s2380_s29 }
 0x46d   : > { %1790 = vst.msk [vmem:[#allocation2 + $0x18] sm:$0xf] %vm1765_vm11, %v1764_v9  ;;  %1792 = vrot.lane.b32.xlu1 %v1764_v9, %s2380_s29 }
 0x473   : > { %v1801_v37 = vld [vmem:[#allocation2 + $0x10] sm:$0xf] }
 0x474   : > { %v1858_v51 = vrot.slane %v1801_v37, 6  ;;  %v1822_v34 = vrot.slane %v1801_v37, 4  ;;  %v1803_v15 = vld [vmem:[#allocation2 + $0x18] sm:$0xf]  ;;  %v1841_v50 = vrot.slane %v1801_v37, 5  ;;  %v1873_v45 = vrot.slane %v1801_v37, 7 }
 0x475   : > { %v1845_v52 = vrot.slane %v1803_v15, 3  ;;  %v1877_v63 = vrot.slane %v1803_v15, 5  ;;  %v1862_v56 = vrot.slane %v1803_v15, 4  ;;  %v1828_v25 = vrot.slane %v1803_v15, 2 }
 0x4cd   : > { %v1769_v35 = vpop.permute.xlu0 %1768 }
 0x4ce   : > { %1772 = vst.msk [vmem:[#allocation2 + $0x4] sm:$0xf] %vm1765_vm11, %v1769_v35  ;;  %v1777_v19 = vpop.permute.xlu1 %1776 }
 0x4cf   : > { %1780 = vst.msk [vmem:[#allocation2 + $0xc] sm:$0xf] %vm1765_vm11, %v1777_v19 }
 0x4d5   : > { %v1798_v61 = vld [vmem:[#allocation2 + $0x4] sm:$0xf] }
 0x4d6   : > { %v1800_v10 = vld [vmem:[#allocation2 + $0xc] sm:$0xf]  ;;  %v1853_v3 = vrot.slane %v1798_v61, 1  ;;  %v1813_v40 = vrot.slane %v1798_v61, 7  ;;  %v1868_v59 = vrot.slane %v1798_v61, 2  ;;  %v1836_v55 = vsel %vm1814_vm12, %v1798_v61, %v1835_v24 }
 0x4d7   : > { %v1856_v62 = vrot.slane %v1800_v10, 7  ;;  %v1819_v28 = vrot.slane %v1800_v10, 5  ;;  %v1839_v6 = vrot.slane %v1800_v10, 6  ;;  %v1838_v60 = vsel %vm1817_vm13, %v1837_v42, %v1836_v55  ;;  %v2125_v42 = vld [vmem:[#allocation3] ss:$0 sm:$0xff] }
 0x4d8   : > { %v1854_v36 = vsel %vm1814_vm12, %v1853_v3, %v1852_v5  ;;  %v1815_v26 = vsel %vm1814_vm12, %v1813_v40, %v1797_v14  ;;  %v1869_v4 = vsel %vm1814_vm12, %v1868_v59, %v1867_v41  ;;  %v3550_v59 = vlaneseq  ;;  %v2124_v41 = vld [vmem:[%s3458_s10] ss:$0 sm:$0xff] }
 0x4d9   : > { %v1855_v11 = vsel %vm1817_vm13, %v1799_v8, %v1854_v36  ;;  %v1818_v31 = vsel %vm1817_vm13, %v1816_v33, %v1815_v26  ;;  %v1871_v2 = vsel %vm1817_vm13, %v1870_v46, %v1869_v4  ;;  %v1840_v7 = vsel %vm1820_vm14, %v1839_v6, %v1838_v60 }
 0x4da   : > { %v1857_v44 = vsel %vm1820_vm14, %v1856_v62, %v1855_v11  ;;  %v1821_v9 = vsel %vm1820_vm14, %v1819_v28, %v1818_v31  ;;  %v1872_v17 = vsel %vm1820_vm14, %v1800_v10, %v1871_v2  ;;  %v1842_v47 = vsel %vm1823_vm15, %v1841_v50, %v1840_v7 }
 0x4db   : > { %v1859_v48 = vsel %vm1823_vm15, %v1858_v51, %v1857_v44  ;;  %v1824_v12 = vsel %vm1823_vm15, %v1822_v34, %v1821_v9  ;;  %v1874_v30 = vsel %vm1823_vm15, %v1873_v45, %v1872_v17  ;;  %v1996_v11 = vand.u32 127, %v3550_v59  ;;  %v2123_v34 = vld [vmem:[%s3457_s9] ss:$0 sm:$0xff] }
 0x4dd   : > { %vm1997_vm3 = vcmp.lt.s32.totalorder %v1996_v11, 16  ;;  %vm2027_vm4 = vcmp.eq.s32.totalorder %v1996_v11, 16 }
 0x4de   : > { %v1785_v16 = vpop.permute.xlu0 %1784 }
 0x4df   : > { %1788 = vst.msk [vmem:[#allocation2 + $0x14] sm:$0xf] %vm1765_vm11, %v1785_v16  ;;  %v1793_v57 = vpop.permute.xlu1 %1792 }
 0x4e0   : > { %1796 = vst.msk [vmem:[#allocation2 + $0x1c] sm:$0xf] %vm1765_vm11, %v1793_v57 }
 0x4e6   : > { %v1802_v53 = vld [vmem:[#allocation2 + $0x14] sm:$0xf] }
 0x4e7   : > { %v1804_v1 = vld [vmem:[#allocation2 + $0x1c] sm:$0xf]  ;;  %v1843_v38 = vrot.slane %v1802_v53, 4  ;;  %v1875_v22 = vrot.slane %v1802_v53, 6  ;;  %v1860_v21 = vrot.slane %v1802_v53, 5  ;;  %v1825_v39 = vrot.slane %v1802_v53, 3 }
 0x4e8   : > { %v1847_v20 = vrot.slane %v1804_v1, 2  ;;  %v1879_v23 = vrot.slane %v1804_v1, 4  ;;  %v1864_v32 = vrot.slane %v1804_v1, 3  ;;  %v1831_v0 = vrot.slane %v1804_v1, 1 }
 0x4e9   : > { %v1844_v43 = vsel %vm1826_vm0, %v1843_v38, %v1842_v47  ;;  %v1876_v54 = vsel %vm1826_vm0, %v1875_v22, %v1874_v30  ;;  %v1861_v35 = vsel %vm1826_vm0, %v1860_v21, %v1859_v48  ;;  %v1827_v19 = vsel %vm1826_vm0, %v1825_v39, %v1824_v12 }
 0x4ea   : > { %v1846_v14 = vsel %vm1829_vm1, %v1845_v52, %v1844_v43  ;;  %v1878_v8 = vsel %vm1829_vm1, %v1877_v63, %v1876_v54  ;;  %v1863_v61 = vsel %vm1829_vm1, %v1862_v56, %v1861_v35  ;;  %v1830_v37 = vsel %vm1829_vm1, %v1828_v25, %v1827_v19 }
 0x4eb   : > { %v1848_v10 = vsel %vm1832_vm2, %v1847_v20, %v1846_v14  ;;  %v1880_v5 = vsel %vm1832_vm2, %v1879_v23, %v1878_v8  ;;  %v1865_v3 = vsel %vm1832_vm2, %v1864_v32, %v1863_v61  ;;  %v1833_v40 = vsel %vm1832_vm2, %v1831_v0, %v1830_v37 }
 0x4ec   : > { %v2353_v62 = vpack.i.bf16 %v1848_v10, %v1880_v5 }
 0x4ee   : > { %2354 = vrot.lane.b32.xlu0 %v2353_v62, %s2380_s29 }
 0x560   : > { %v2355_v33 = vpop.permute.xlu0 %2354 }
 0x561   : > { %v2357_v28 = vunpack.i.h.bf16 %v2355_v33  ;;  %v2356_v36 = vunpack.i.l.bf16 %v2355_v33 }
 0x563   : > { %v1885_v51 = vsel %vm1615_vm10, %v1865_v3, %v2356_v36  ;;  %v1884_v26 = vsel %vm1615_vm10, %v1833_v40, %v2357_v28 }
 0x564   : > { %1989 = vmatprep.mubr.f32.mxu0 %v1885_v51 }
 0x565   : > { %1990 = vmatmul.mubr.f32.vlgmr.msra.gmra.mrb[20].mxu0 %v1884_v26 }
 0x638   : > { %v2161_v31 = vpop.f32.mrb[20].mxu0 }
 0x639   : > { %v2162_v44 = vpop.f32.mrb[21].mxu0 }
 0x63a   : > { %v2163_v9 = vadd.f32 %v2162_v44, %v2161_v31 }
 0x63c   : > { %v1992_v24 = vadd.f32 %v2163_v9, %v2123_v34 }
 0x63e   : > { %v2008_v48 = vmax.f32 %v1992_v24, 0.0  ;;  %v1998_v12 = vsel %vm1997_vm3, %v1992_v24, -1e+30 }
 0x63f   : > { %1999 = vmax.xlane.f32.xlu1 %v1998_v12 }
 0x640   : > { %v2016_v55 = vmul.f32 %v2124_v41, %v2008_v48 }
 0x642   : > { %2017 = vadd.xlane.f32.xlu0 %v2016_v55 }
 0x6cc   : > { %v2000_v4 = vpop.xlane.xlu1 %1999 }
 0x6cd   : > { %v2001_v16 = vsub.f32 %v1998_v12, %v2000_v4 }
 0x6cf   : > { %v2002_v46 = vmul.f32 1.442695, %v2001_v16  ;;  %v2018_v49 = vpop.xlane.xlu0 %2017 }
 0x6d0   : > { %v2026_v18 = vadd.f32 %v2125_v42, %v2018_v49 }
 0x6d1   : > { %2358 = vpow2.f32 %v2002_v46 }
 0x6d2   : > { %2030 = vperm.xlu1 %2352, %v2026_v18  }
 0x6db   : > { %v2359_v57 = vpop.eup %2358 }
 0x6dc   : > { %2004 = vadd.xlane.f32.xlu0 %v2359_v57 }
 0x751   : > { %v2031_v29 = vpop.permute.xlu1 %2030 }
 0x752   : > { %v2033_v60 = vsel %vm2027_vm4, %v2031_v29, 0.0 }
 0x769   : > { %v2005_v6 = vpop.xlane.xlu0 %2004 }
 0x76a   : > { %2360 = vrcp.f32 %v2005_v6 }
 0x774   : > { %v2361_v27 = vpop.eup %2360 }
 0x775   : > { %v2007_v13 = vmul.f32 %v2361_v27, %v2359_v57 }
 0x777   : > { %v2034_v2 = vsel %vm1997_vm3, %v2007_v13, %v2033_v60 }
 0x778   : > { %2035 = vst [vmem:[%s413_s26] sm:$0xff] %v2034_v2 }
 0x779 PF: > { %s24_s23 = sadd.s32 1, %s2368_s23  }
 0x77a   : > { %p21_p4 = scmp.ge.s32.totalorder %s24_s23, 4  }
 0x77c   :  { %23 = sbr.rel (!%p21_p4) target bundleno = 3 (0x3), region = 105 }

</bundles_post_ra>
